<compile_context>
chip_gen: v6e
topology: v6e:2x2x1
jax: 0.10.0
libtpu: 0.0.40
codegen_flags: <defaults>
</compile_context>

<pallas_src>
import functools
import numpy as np
import jax
import jax.numpy as jnp
from jax.experimental import pallas as pl
from jax.experimental.pallas import tpu as pltpu


def lstm_kernel(x_ref, wih1_ref, whh1_ref, b1_ref,
                w2cat_ref, b2_ref, wfc_ref, bfc_ref,
                out_ref, *, batch):
    """Whole-sequence 2-layer LSTM + FC in one kernel invocation.

    x_ref:     (T*B, D)     time-major, batch-flattened input
    wih1_ref:  (D, 4H)      layer-1 input->gates weight (pre-transposed)
    whh1_ref:  (H, 4H)      layer-1 hidden->gates weight
    b1_ref:    (1, 4H)      layer-1 combined bias (b_ih + b_hh)
    w2cat_ref: (2H, 4H)     layer-2 fused [W_ih2; W_hh2] weight
    b2_ref:    (1, 4H)      layer-2 combined bias
    wfc_ref:   (H, O), bfc_ref: (1, O)
    out_ref:   (T*B, O)
    """
    TB, _ = x_ref.shape
    H4 = whh1_ref.shape[1]
    H = H4 // 4
    B = batch
    T = TB // B

    # ---- hoist all weights / biases into registers once (outside the loop) ----
    whh1 = whh1_ref[...]                                   # (H, 4H)
    w2cat = w2cat_ref[...]                                 # (2H, 4H)
    b2 = jnp.broadcast_to(b2_ref[...], (B, H4))            # broadcast hoisted
    wfc = wfc_ref[...]                                     # (H, O)
    bfc = bfc_ref[...]                                     # (1, O)

    # ---- non-recurrent layer-1 input projection for ALL timesteps at once ----
    xg1 = (jnp.dot(x_ref[...], wih1_ref[...],
                   preferred_element_type=jnp.float32)
           + b1_ref[...])                                  # (T*B, 4H)

    zeros = jnp.zeros((B, H), jnp.float32)
    h1, c1, h2, c2 = zeros, zeros, zeros, zeros

    def gate_math(gates, c):
        # two full-vreg EUP passes instead of four sliced activations
        sg = jax.nn.sigmoid(gates)                         # (B, 4H)
        tg = jnp.tanh(gates)                               # (B, 4H)
        i = sg[:, 0 * H:1 * H]
        f = sg[:, 1 * H:2 * H]
        g = tg[:, 2 * H:3 * H]
        o = sg[:, 3 * H:4 * H]
        c_new = f * c + i * g
        h_new = o * jnp.tanh(c_new)
        return h_new, c_new

    h2_steps = []
    # Fully unrolled static time loop (T is small & static) -> max LLO
    # scheduler visibility; only h @ W_hh matmuls remain in the recurrence.
    for t in range(T):
        # layer 1: precomputed input projection + one recurrent matmul
        g1 = xg1[t * B:(t + 1) * B, :] + jnp.dot(
            h1, whh1, preferred_element_type=jnp.float32)
        h1, c1 = gate_math(g1, c1)

        # layer 2: single fused matmul over concat(h1, h2)
        hcat = jnp.concatenate([h1, h2], axis=1)           # (B, 2H)
        g2 = jnp.dot(hcat, w2cat,
                     preferred_element_type=jnp.float32) + b2
        h2, c2 = gate_math(g2, c2)
        h2_steps.append(h2)

    # ---- FC head once, single dense writeback ----
    h2_all = jnp.concatenate(h2_steps, axis=0)             # (T*B, H)
    out_ref[...] = (jnp.dot(h2_all, wfc,
                            preferred_element_type=jnp.float32) + bfc)


@jax.jit
def lstm_forward(x, wih1, whh1, b1, w2cat, b2, wfc, bfc):
    """x: (B, T, D) float32 -> (B, T, O) float32 (teacher_forcing=True path)."""
    B, T, D = x.shape
    H = whh1.shape[0]
    O = wfc.shape[1]

    # time-major, batch-flattened input rows: row t*B + b == x[b, t, :]
    x_flat = jnp.transpose(x, (1, 0, 2)).reshape(T * B, D)

    flops = 2 * T * B * (D * 4 * H + H * 4 * H + 2 * H * 4 * H + H * O)
    transcendentals = T * B * 10 * H
    bytes_accessed = 4 * (T * B * D + D * 4 * H + H * 4 * H + 4 * H
                          + 2 * H * 4 * H + 4 * H + H * O + O + T * B * O)

    vmem_specs = [pl.BlockSpec(memory_space=pltpu.MemorySpace.VMEM)
                  for _ in range(8)]

    out_flat = pl.pallas_call(
        functools.partial(lstm_kernel, batch=B),
        out_shape=jax.ShapeDtypeStruct((T * B, O), jnp.float32),
        in_specs=vmem_specs,
        out_specs=pl.BlockSpec(memory_space=pltpu.MemorySpace.VMEM),
        cost_estimate=pl.CostEstimate(flops=flops,
                                      transcendentals=transcendentals,
                                      bytes_accessed=bytes_accessed),
    )(x_flat, wih1, whh1, b1, w2cat, b2, wfc, bfc)

    return jnp.transpose(out_flat.reshape(T, B, O), (1, 0, 2))


# ------------- pure-JAX reference (mirrors torch.nn.LSTM semantics) -------------
def lstm_ref(x, wih1, whh1, b1, wih2, whh2, b2, wfc, bfc):
    B, T, D = x.shape
    H = whh1.shape[0]

    def cell(x_t, h, c, wih, whh, b):
        gates = x_t @ wih + h @ whh + b
        i = jax.nn.sigmoid(gates[:, 0 * H:1 * H])
        f = jax.nn.sigmoid(gates[:, 1 * H:2 * H])
        g = jnp.tanh(gates[:, 2 * H:3 * H])
        o = jax.nn.sigmoid(gates[:, 3 * H:4 * H])
        c_new = f * c + i * g
        return o * jnp.tanh(c_new), c_new

    def scan_fn(carry, x_t):
        h1, c1, h2, c2 = carry
        h1, c1 = cell(x_t, h1, c1, wih1, whh1, b1)
        h2, c2 = cell(h1, h2, c2, wih2, whh2, b2)
        y = h2 @ wfc + bfc
        return (h1, c1, h2, c2), y

    init = tuple(jnp.zeros((B, H), jnp.float32) for _ in range(4))
    _, ys = jax.lax.scan(scan_fn, init, jnp.transpose(x, (1, 0, 2)))
    return jnp.transpose(ys, (1, 0, 2))


if __name__ == "__main__":
    # args.isweather = False -> input_size = 5 ; hidden_size = 20 ; out_size = 3
    INPUT_SIZE, HIDDEN, OUT = 5, 20, 3
    B, T = 2, 8

    key = jax.random.PRNGKey(0)
    keys = jax.random.split(key, 12)
    bound = 1.0 / np.sqrt(HIDDEN)   # PyTorch LSTM/Linear default init range

    def u(k, shape):
        return jax.random.uniform(k, shape, jnp.float32, -bound, bound)

    # PyTorch-shaped parameters (gate order i, f, g, o)
    W_ih1 = u(keys[0], (4 * HIDDEN, INPUT_SIZE))
    W_hh1 = u(keys[1], (4 * HIDDEN, HIDDEN))
    b_ih1 = u(keys[2], (4 * HIDDEN,))
    b_hh1 = u(keys[3], (4 * HIDDEN,))
    W_ih2 = u(keys[4], (4 * HIDDEN, HIDDEN))
    W_hh2 = u(keys[5], (4 * HIDDEN, HIDDEN))
    b_ih2 = u(keys[6], (4 * HIDDEN,))
    b_hh2 = u(keys[7], (4 * HIDDEN,))
    W_fc = u(keys[8], (OUT, HIDDEN))
    b_fc = u(keys[9], (OUT,))

    # Kernel-layout parameters (right-multiply form, layer-2 weights fused)
    wih1 = W_ih1.T                                   # (D, 4H)
    whh1 = W_hh1.T                                   # (H, 4H)
    b1 = (b_ih1 + b_hh1)[None, :]                    # (1, 4H)
    wih2 = W_ih2.T                                   # (H, 4H)
    whh2 = W_hh2.T                                   # (H, 4H)
    w2cat = jnp.concatenate([wih2, whh2], axis=0)    # (2H, 4H)
    b2 = (b_ih2 + b_hh2)[None, :]                    # (1, 4H)
    wfc = W_fc.T                                     # (H, O)
    bfc = b_fc[None, :]                              # (1, O)

    x = jax.random.normal(keys[10], (B, T, INPUT_SIZE), jnp.float32)

    out = lstm_forward(x, wih1, whh1, b1, w2cat, b2, wfc, bfc)
    out = jax.block_until_ready(out)

    ref = lstm_ref(x, wih1, whh1, b1, wih2, whh2, b2, wfc, bfc)
    assert out.shape == (B, T, OUT)
    np.testing.assert_allclose(np.asarray(out), np.asarray(ref),
                               rtol=1e-5, atol=1e-5)

    # TODO(synk): the teacher_forcing=False autoregressive branch (feeding
    # outputs back into input columns 2:5) is not implemented.
    print("KERNEL_OK")
</pallas_src>

<mosaic_0001>
module attributes {stable_mosaic.version = 11 : i64} {
  func.func @lstm_kernel(%arg0: memref<16x5xf32, #tpu.memory_space<vmem>>, %arg1: memref<5x80xf32, #tpu.memory_space<vmem>>, %arg2: memref<20x80xf32, #tpu.memory_space<vmem>>, %arg3: memref<1x80xf32, #tpu.memory_space<vmem>>, %arg4: memref<40x80xf32, #tpu.memory_space<vmem>>, %arg5: memref<1x80xf32, #tpu.memory_space<vmem>>, %arg6: memref<20x3xf32, #tpu.memory_space<vmem>>, %arg7: memref<1x3xf32, #tpu.memory_space<vmem>>, %arg8: memref<16x3xf32, #tpu.memory_space<vmem>>) attributes {dimension_semantics = [], scalar_prefetch = 0 : i64, scratch_operands = 0 : i64, tpu.core_type = #tpu.core_type<tc>} {
    %c0 = arith.constant 0 : index
    %c0_0 = arith.constant 0 : index
    %0 = vector.load %arg2[%c0, %c0_0] : memref<20x80xf32, #tpu.memory_space<vmem>>, vector<20x80xf32>
    %c0_1 = arith.constant 0 : index
    %c0_2 = arith.constant 0 : index
    %1 = vector.load %arg4[%c0_1, %c0_2] : memref<40x80xf32, #tpu.memory_space<vmem>>, vector<40x80xf32>
    %c0_3 = arith.constant 0 : index
    %c0_4 = arith.constant 0 : index
    %2 = vector.load %arg5[%c0_3, %c0_4] : memref<1x80xf32, #tpu.memory_space<vmem>>, vector<1x80xf32>
    %3 = vector.shape_cast %2 : vector<1x80xf32> to vector<1x80xf32>
    %4 = vector.broadcast %3 : vector<1x80xf32> to vector<2x80xf32>
    %c0_5 = arith.constant 0 : index
    %c0_6 = arith.constant 0 : index
    %5 = vector.load %arg6[%c0_5, %c0_6] : memref<20x3xf32, #tpu.memory_space<vmem>>, vector<20x3xf32>
    %c0_7 = arith.constant 0 : index
    %c0_8 = arith.constant 0 : index
    %6 = vector.load %arg7[%c0_7, %c0_8] : memref<1x3xf32, #tpu.memory_space<vmem>>, vector<1x3xf32>
    %c0_9 = arith.constant 0 : index
    %c0_10 = arith.constant 0 : index
    %7 = vector.load %arg0[%c0_9, %c0_10] : memref<16x5xf32, #tpu.memory_space<vmem>>, vector<16x5xf32>
    %c0_11 = arith.constant 0 : index
    %c0_12 = arith.constant 0 : index
    %8 = vector.load %arg1[%c0_11, %c0_12] : memref<5x80xf32, #tpu.memory_space<vmem>>, vector<5x80xf32>
    %cst = arith.constant dense<0.000000e+00> : vector<16x80xf32>
    %9 = tpu.matmul %7, %8, %cst {dimension_numbers = #tpu.dot_dimension_numbers<[1], [0], [0], [1], [0, 0, 1, 1], [], []>} : vector<16x5xf32>, vector<5x80xf32>, vector<16x80xf32> -> vector<16x80xf32>
    %c0_13 = arith.constant 0 : index
    %c0_14 = arith.constant 0 : index
    %10 = vector.load %arg3[%c0_13, %c0_14] : memref<1x80xf32, #tpu.memory_space<vmem>>, vector<1x80xf32>
    %11 = vector.broadcast %10 : vector<1x80xf32> to vector<16x80xf32>
    %12 = arith.addf %9, %11 : vector<16x80xf32>
    %cst_15 = arith.constant 0.000000e+00 : f32
    %13 = vector.broadcast %cst_15 : f32 to vector<2x20xf32>
    %14 = vector.extract_strided_slice %12 {offsets = [0, 0], sizes = [2, 80], strides = [1, 1]} : vector<16x80xf32> to vector<2x80xf32>
    %cst_16 = arith.constant dense<0.000000e+00> : vector<2x80xf32>
    %15 = tpu.matmul %13, %0, %cst_16 {dimension_numbers = #tpu.dot_dimension_numbers<[1], [0], [0], [1], [0, 0, 1, 1], [], []>} : vector<2x20xf32>, vector<20x80xf32>, vector<2x80xf32> -> vector<2x80xf32>
    %16 = arith.addf %14, %15 : vector<2x80xf32>
    %17 = arith.negf %16 : vector<2x80xf32>
    %18 = math.exp %17 : vector<2x80xf32>
    %cst_17 = arith.constant 1.000000e+00 : f32
    %19 = vector.broadcast %cst_17 : f32 to vector<2x80xf32>
    %20 = arith.addf %19, %18 : vector<2x80xf32>
    %21 = arith.divf %19, %20 : vector<2x80xf32>
    %22 = math.tanh %16 : vector<2x80xf32>
    %23 = vector.extract_strided_slice %21 {offsets = [0, 0], sizes = [2, 20], strides = [1, 1]} : vector<2x80xf32> to vector<2x20xf32>
    %24 = vector.extract_strided_slice %21 {offsets = [0, 20], sizes = [2, 20], strides = [1, 1]} : vector<2x80xf32> to vector<2x20xf32>
    %25 = vector.extract_strided_slice %22 {offsets = [0, 40], sizes = [2, 20], strides = [1, 1]} : vector<2x80xf32> to vector<2x20xf32>
    %26 = vector.extract_strided_slice %21 {offsets = [0, 60], sizes = [2, 20], strides = [1, 1]} : vector<2x80xf32> to vector<2x20xf32>
    %27 = arith.mulf %24, %13 : vector<2x20xf32>
    %28 = arith.mulf %23, %25 : vector<2x20xf32>
    %29 = arith.addf %27, %28 : vector<2x20xf32>
    %30 = math.tanh %29 : vector<2x20xf32>
    %31 = arith.mulf %26, %30 : vector<2x20xf32>
    %32 = tpu.concatenate %31, %13 in 1 : vector<2x20xf32>, vector<2x20xf32> -> vector<2x40xf32>
    %cst_18 = arith.constant dense<0.000000e+00> : vector<2x80xf32>
    %33 = tpu.matmul %32, %1, %cst_18 {dimension_numbers = #tpu.dot_dimension_numbers<[1], [0], [0], [1], [0, 0, 1, 1], [], []>} : vector<2x40xf32>, vector<40x80xf32>, vector<2x80xf32> -> vector<2x80xf32>
    %34 = arith.addf %33, %4 : vector<2x80xf32>
    %35 = arith.negf %34 : vector<2x80xf32>
    %36 = math.exp %35 : vector<2x80xf32>
    %cst_19 = arith.constant 1.000000e+00 : f32
    %37 = vector.broadcast %cst_19 : f32 to vector<2x80xf32>
    %38 = arith.addf %37, %36 : vector<2x80xf32>
    %39 = arith.divf %37, %38 : vector<2x80xf32>
    %40 = math.tanh %34 : vector<2x80xf32>
    %41 = vector.extract_strided_slice %39 {offsets = [0, 0], sizes = [2, 20], strides = [1, 1]} : vector<2x80xf32> to vector<2x20xf32>
    %42 = vector.extract_strided_slice %39 {offsets = [0, 20], sizes = [2, 20], strides = [1, 1]} : vector<2x80xf32> to vector<2x20xf32>
    %43 = vector.extract_strided_slice %40 {offsets = [0, 40], sizes = [2, 20], strides = [1, 1]} : vector<2x80xf32> to vector<2x20xf32>
    %44 = vector.extract_strided_slice %39 {offsets = [0, 60], sizes = [2, 20], strides = [1, 1]} : vector<2x80xf32> to vector<2x20xf32>
    %45 = arith.mulf %42, %13 : vector<2x20xf32>
    %46 = arith.mulf %41, %43 : vector<2x20xf32>
    %47 = arith.addf %45, %46 : vector<2x20xf32>
    %48 = math.tanh %47 : vector<2x20xf32>
    %49 = arith.mulf %44, %48 : vector<2x20xf32>
    %50 = vector.extract_strided_slice %12 {offsets = [2, 0], sizes = [2, 80], strides = [1, 1]} : vector<16x80xf32> to vector<2x80xf32>
    %cst_20 = arith.constant dense<0.000000e+00> : vector<2x80xf32>
    %51 = tpu.matmul %31, %0, %cst_20 {dimension_numbers = #tpu.dot_dimension_numbers<[1], [0], [0], [1], [0, 0, 1, 1], [], []>} : vector<2x20xf32>, vector<20x80xf32>, vector<2x80xf32> -> vector<2x80xf32>
    %52 = arith.addf %50, %51 : vector<2x80xf32>
    %53 = arith.negf %52 : vector<2x80xf32>
    %54 = math.exp %53 : vector<2x80xf32>
    %cst_21 = arith.constant 1.000000e+00 : f32
    %55 = vector.broadcast %cst_21 : f32 to vector<2x80xf32>
    %56 = arith.addf %55, %54 : vector<2x80xf32>
    %57 = arith.divf %55, %56 : vector<2x80xf32>
    %58 = math.tanh %52 : vector<2x80xf32>
    %59 = vector.extract_strided_slice %57 {offsets = [0, 0], sizes = [2, 20], strides = [1, 1]} : vector<2x80xf32> to vector<2x20xf32>
    %60 = vector.extract_strided_slice %57 {offsets = [0, 20], sizes = [2, 20], strides = [1, 1]} : vector<2x80xf32> to vector<2x20xf32>
    %61 = vector.extract_strided_slice %58 {offsets = [0, 40], sizes = [2, 20], strides = [1, 1]} : vector<2x80xf32> to vector<2x20xf32>
    %62 = vector.extract_strided_slice %57 {offsets = [0, 60], sizes = [2, 20], strides = [1, 1]} : vector<2x80xf32> to vector<2x20xf32>
    %63 = arith.mulf %60, %29 : vector<2x20xf32>
    %64 = arith.mulf %59, %61 : vector<2x20xf32>
    %65 = arith.addf %63, %64 : vector<2x20xf32>
    %66 = math.tanh %65 : vector<2x20xf32>
    %67 = arith.mulf %62, %66 : vector<2x20xf32>
    %68 = tpu.concatenate %67, %49 in 1 : vector<2x20xf32>, vector<2x20xf32> -> vector<2x40xf32>
    %cst_22 = arith.constant dense<0.000000e+00> : vector<2x80xf32>
    %69 = tpu.matmul %68, %1, %cst_22 {dimension_numbers = #tpu.dot_dimension_numbers<[1], [0], [0], [1], [0, 0, 1, 1], [], []>} : vector<2x40xf32>, vector<40x80xf32>, vector<2x80xf32> -> vector<2x80xf32>
    %70 = arith.addf %69, %4 : vector<2x80xf32>
    %71 = arith.negf %70 : vector<2x80xf32>
    %72 = math.exp %71 : vector<2x80xf32>
    %cst_23 = arith.constant 1.000000e+00 : f32
    %73 = vector.broadcast %cst_23 : f32 to vector<2x80xf32>
    %74 = arith.addf %73, %72 : vector<2x80xf32>
    %75 = arith.divf %73, %74 : vector<2x80xf32>
    %76 = math.tanh %70 : vector<2x80xf32>
    %77 = vector.extract_strided_slice %75 {offsets = [0, 0], sizes = [2, 20], strides = [1, 1]} : vector<2x80xf32> to vector<2x20xf32>
    %78 = vector.extract_strided_slice %75 {offsets = [0, 20], sizes = [2, 20], strides = [1, 1]} : vector<2x80xf32> to vector<2x20xf32>
    %79 = vector.extract_strided_slice %76 {offsets = [0, 40], sizes = [2, 20], strides = [1, 1]} : vector<2x80xf32> to vector<2x20xf32>
    %80 = vector.extract_strided_slice %75 {offsets = [0, 60], sizes = [2, 20], strides = [1, 1]} : vector<2x80xf32> to vector<2x20xf32>
    %81 = arith.mulf %78, %47 : vector<2x20xf32>
    %82 = arith.mulf %77, %79 : vector<2x20xf32>
    %83 = arith.addf %81, %82 : vector<2x20xf32>
    %84 = math.tanh %83 : vector<2x20xf32>
    %85 = arith.mulf %80, %84 : vector<2x20xf32>
    %86 = vector.extract_strided_slice %12 {offsets = [4, 0], sizes = [2, 80], strides = [1, 1]} : vector<16x80xf32> to vector<2x80xf32>
    %cst_24 = arith.constant dense<0.000000e+00> : vector<2x80xf32>
    %87 = tpu.matmul %67, %0, %cst_24 {dimension_numbers = #tpu.dot_dimension_numbers<[1], [0], [0], [1], [0, 0, 1, 1], [], []>} : vector<2x20xf32>, vector<20x80xf32>, vector<2x80xf32> -> vector<2x80xf32>
    %88 = arith.addf %86, %87 : vector<2x80xf32>
    %89 = arith.negf %88 : vector<2x80xf32>
    %90 = math.exp %89 : vector<2x80xf32>
    %cst_25 = arith.constant 1.000000e+00 : f32
    %91 = vector.broadcast %cst_25 : f32 to vector<2x80xf32>
    %92 = arith.addf %91, %90 : vector<2x80xf32>
    %93 = arith.divf %91, %92 : vector<2x80xf32>
    %94 = math.tanh %88 : vector<2x80xf32>
    %95 = vector.extract_strided_slice %93 {offsets = [0, 0], sizes = [2, 20], strides = [1, 1]} : vector<2x80xf32> to vector<2x20xf32>
    %96 = vector.extract_strided_slice %93 {offsets = [0, 20], sizes = [2, 20], strides = [1, 1]} : vector<2x80xf32> to vector<2x20xf32>
    %97 = vector.extract_strided_slice %94 {offsets = [0, 40], sizes = [2, 20], strides = [1, 1]} : vector<2x80xf32> to vector<2x20xf32>
    %98 = vector.extract_strided_slice %93 {offsets = [0, 60], sizes = [2, 20], strides = [1, 1]} : vector<2x80xf32> to vector<2x20xf32>
    %99 = arith.mulf %96, %65 : vector<2x20xf32>
    %100 = arith.mulf %95, %97 : vector<2x20xf32>
    %101 = arith.addf %99, %100 : vector<2x20xf32>
    %102 = math.tanh %101 : vector<2x20xf32>
    %103 = arith.mulf %98, %102 : vector<2x20xf32>
    %104 = tpu.concatenate %103, %85 in 1 : vector<2x20xf32>, vector<2x20xf32> -> vector<2x40xf32>
    %cst_26 = arith.constant dense<0.000000e+00> : vector<2x80xf32>
    %105 = tpu.matmul %104, %1, %cst_26 {dimension_numbers = #tpu.dot_dimension_numbers<[1], [0], [0], [1], [0, 0, 1, 1], [], []>} : vector<2x40xf32>, vector<40x80xf32>, vector<2x80xf32> -> vector<2x80xf32>
    %106 = arith.addf %105, %4 : vector<2x80xf32>
    %107 = arith.negf %106 : vector<2x80xf32>
    %108 = math.exp %107 : vector<2x80xf32>
    %cst_27 = arith.constant 1.000000e+00 : f32
    %109 = vector.broadcast %cst_27 : f32 to vector<2x80xf32>
    %110 = arith.addf %109, %108 : vector<2x80xf32>
    %111 = arith.divf %109, %110 : vector<2x80xf32>
    %112 = math.tanh %106 : vector<2x80xf32>
    %113 = vector.extract_strided_slice %111 {offsets = [0, 0], sizes = [2, 20], strides = [1, 1]} : vector<2x80xf32> to vector<2x20xf32>
    %114 = vector.extract_strided_slice %111 {offsets = [0, 20], sizes = [2, 20], strides = [1, 1]} : vector<2x80xf32> to vector<2x20xf32>
    %115 = vector.extract_strided_slice %112 {offsets = [0, 40], sizes = [2, 20], strides = [1, 1]} : vector<2x80xf32> to vector<2x20xf32>
    %116 = vector.extract_strided_slice %111 {offsets = [0, 60], sizes = [2, 20], strides = [1, 1]} : vector<2x80xf32> to vector<2x20xf32>
    %117 = arith.mulf %114, %83 : vector<2x20xf32>
    %118 = arith.mulf %113, %115 : vector<2x20xf32>
    %119 = arith.addf %117, %118 : vector<2x20xf32>
    %120 = math.tanh %119 : vector<2x20xf32>
    %121 = arith.mulf %116, %120 : vector<2x20xf32>
    %122 = vector.extract_strided_slice %12 {offsets = [6, 0], sizes = [2, 80], strides = [1, 1]} : vector<16x80xf32> to vector<2x80xf32>
    %cst_28 = arith.constant dense<0.000000e+00> : vector<2x80xf32>
    %123 = tpu.matmul %103, %0, %cst_28 {dimension_numbers = #tpu.dot_dimension_numbers<[1], [0], [0], [1], [0, 0, 1, 1], [], []>} : vector<2x20xf32>, vector<20x80xf32>, vector<2x80xf32> -> vector<2x80xf32>
    %124 = arith.addf %122, %123 : vector<2x80xf32>
    %125 = arith.negf %124 : vector<2x80xf32>
    %126 = math.exp %125 : vector<2x80xf32>
    %cst_29 = arith.constant 1.000000e+00 : f32
    %127 = vector.broadcast %cst_29 : f32 to vector<2x80xf32>
    %128 = arith.addf %127, %126 : vector<2x80xf32>
    %129 = arith.divf %127, %128 : vector<2x80xf32>
    %130 = math.tanh %124 : vector<2x80xf32>
    %131 = vector.extract_strided_slice %129 {offsets = [0, 0], sizes = [2, 20], strides = [1, 1]} : vector<2x80xf32> to vector<2x20xf32>
    %132 = vector.extract_strided_slice %129 {offsets = [0, 20], sizes = [2, 20], strides = [1, 1]} : vector<2x80xf32> to vector<2x20xf32>
    %133 = vector.extract_strided_slice %130 {offsets = [0, 40], sizes = [2, 20], strides = [1, 1]} : vector<2x80xf32> to vector<2x20xf32>
    %134 = vector.extract_strided_slice %129 {offsets = [0, 60], sizes = [2, 20], strides = [1, 1]} : vector<2x80xf32> to vector<2x20xf32>
    %135 = arith.mulf %132, %101 : vector<2x20xf32>
    %136 = arith.mulf %131, %133 : vector<2x20xf32>
    %137 = arith.addf %135, %136 : vector<2x20xf32>
    %138 = math.tanh %137 : vector<2x20xf32>
    %139 = arith.mulf %134, %138 : vector<2x20xf32>
    %140 = tpu.concatenate %139, %121 in 1 : vector<2x20xf32>, vector<2x20xf32> -> vector<2x40xf32>
    %cst_30 = arith.constant dense<0.000000e+00> : vector<2x80xf32>
    %141 = tpu.matmul %140, %1, %cst_30 {dimension_numbers = #tpu.dot_dimension_numbers<[1], [0], [0], [1], [0, 0, 1, 1], [], []>} : vector<2x40xf32>, vector<40x80xf32>, vector<2x80xf32> -> vector<2x80xf32>
    %142 = arith.addf %141, %4 : vector<2x80xf32>
    %143 = arith.negf %142 : vector<2x80xf32>
    %144 = math.exp %143 : vector<2x80xf32>
    %cst_31 = arith.constant 1.000000e+00 : f32
    %145 = vector.broadcast %cst_31 : f32 to vector<2x80xf32>
    %146 = arith.addf %145, %144 : vector<2x80xf32>
    %147 = arith.divf %145, %146 : vector<2x80xf32>
    %148 = math.tanh %142 : vector<2x80xf32>
    %149 = vector.extract_strided_slice %147 {offsets = [0, 0], sizes = [2, 20], strides = [1, 1]} : vector<2x80xf32> to vector<2x20xf32>
    %150 = vector.extract_strided_slice %147 {offsets = [0, 20], sizes = [2, 20], strides = [1, 1]} : vector<2x80xf32> to vector<2x20xf32>
    %151 = vector.extract_strided_slice %148 {offsets = [0, 40], sizes = [2, 20], strides = [1, 1]} : vector<2x80xf32> to vector<2x20xf32>
    %152 = vector.extract_strided_slice %147 {offsets = [0, 60], sizes = [2, 20], strides = [1, 1]} : vector<2x80xf32> to vector<2x20xf32>
    %153 = arith.mulf %150, %119 : vector<2x20xf32>
    %154 = arith.mulf %149, %151 : vector<2x20xf32>
    %155 = arith.addf %153, %154 : vector<2x20xf32>
    %156 = math.tanh %155 : vector<2x20xf32>
    %157 = arith.mulf %152, %156 : vector<2x20xf32>
    %158 = vector.extract_strided_slice %12 {offsets = [8, 0], sizes = [2, 80], strides = [1, 1]} : vector<16x80xf32> to vector<2x80xf32>
    %cst_32 = arith.constant dense<0.000000e+00> : vector<2x80xf32>
    %159 = tpu.matmul %139, %0, %cst_32 {dimension_numbers = #tpu.dot_dimension_numbers<[1], [0], [0], [1], [0, 0, 1, 1], [], []>} : vector<2x20xf32>, vector<20x80xf32>, vector<2x80xf32> -> vector<2x80xf32>
    %160 = arith.addf %158, %159 : vector<2x80xf32>
    %161 = arith.negf %160 : vector<2x80xf32>
    %162 = math.exp %161 : vector<2x80xf32>
    %cst_33 = arith.constant 1.000000e+00 : f32
    %163 = vector.broadcast %cst_33 : f32 to vector<2x80xf32>
    %164 = arith.addf %163, %162 : vector<2x80xf32>
    %165 = arith.divf %163, %164 : vector<2x80xf32>
    %166 = math.tanh %160 : vector<2x80xf32>
    %167 = vector.extract_strided_slice %165 {offsets = [0, 0], sizes = [2, 20], strides = [1, 1]} : vector<2x80xf32> to vector<2x20xf32>
    %168 = vector.extract_strided_slice %165 {offsets = [0, 20], sizes = [2, 20], strides = [1, 1]} : vector<2x80xf32> to vector<2x20xf32>
    %169 = vector.extract_strided_slice %166 {offsets = [0, 40], sizes = [2, 20], strides = [1, 1]} : vector<2x80xf32> to vector<2x20xf32>
    %170 = vector.extract_strided_slice %165 {offsets = [0, 60], sizes = [2, 20], strides = [1, 1]} : vector<2x80xf32> to vector<2x20xf32>
    %171 = arith.mulf %168, %137 : vector<2x20xf32>
    %172 = arith.mulf %167, %169 : vector<2x20xf32>
    %173 = arith.addf %171, %172 : vector<2x20xf32>
    %174 = math.tanh %173 : vector<2x20xf32>
    %175 = arith.mulf %170, %174 : vector<2x20xf32>
    %176 = tpu.concatenate %175, %157 in 1 : vector<2x20xf32>, vector<2x20xf32> -> vector<2x40xf32>
    %cst_34 = arith.constant dense<0.000000e+00> : vector<2x80xf32>
    %177 = tpu.matmul %176, %1, %cst_34 {dimension_numbers = #tpu.dot_dimension_numbers<[1], [0], [0], [1], [0, 0, 1, 1], [], []>} : vector<2x40xf32>, vector<40x80xf32>, vector<2x80xf32> -> vector<2x80xf32>
    %178 = arith.addf %177, %4 : vector<2x80xf32>
    %179 = arith.negf %178 : vector<2x80xf32>
    %180 = math.exp %179 : vector<2x80xf32>
    %cst_35 = arith.constant 1.000000e+00 : f32
    %181 = vector.broadcast %cst_35 : f32 to vector<2x80xf32>
    %182 = arith.addf %181, %180 : vector<2x80xf32>
    %183 = arith.divf %181, %182 : vector<2x80xf32>
    %184 = math.tanh %178 : vector<2x80xf32>
    %185 = vector.extract_strided_slice %183 {offsets = [0, 0], sizes = [2, 20], strides = [1, 1]} : vector<2x80xf32> to vector<2x20xf32>
    %186 = vector.extract_strided_slice %183 {offsets = [0, 20], sizes = [2, 20], strides = [1, 1]} : vector<2x80xf32> to vector<2x20xf32>
    %187 = vector.extract_strided_slice %184 {offsets = [0, 40], sizes = [2, 20], strides = [1, 1]} : vector<2x80xf32> to vector<2x20xf32>
    %188 = vector.extract_strided_slice %183 {offsets = [0, 60], sizes = [2, 20], strides = [1, 1]} : vector<2x80xf32> to vector<2x20xf32>
    %189 = arith.mulf %186, %155 : vector<2x20xf32>
    %190 = arith.mulf %185, %187 : vector<2x20xf32>
    %191 = arith.addf %189, %190 : vector<2x20xf32>
    %192 = math.tanh %191 : vector<2x20xf32>
    %193 = arith.mulf %188, %192 : vector<2x20xf32>
    %194 = vector.extract_strided_slice %12 {offsets = [10, 0], sizes = [2, 80], strides = [1, 1]} : vector<16x80xf32> to vector<2x80xf32>
    %cst_36 = arith.constant dense<0.000000e+00> : vector<2x80xf32>
    %195 = tpu.matmul %175, %0, %cst_36 {dimension_numbers = #tpu.dot_dimension_numbers<[1], [0], [0], [1], [0, 0, 1, 1], [], []>} : vector<2x20xf32>, vector<20x80xf32>, vector<2x80xf32> -> vector<2x80xf32>
    %196 = arith.addf %194, %195 : vector<2x80xf32>
    %197 = arith.negf %196 : vector<2x80xf32>
    %198 = math.exp %197 : vector<2x80xf32>
    %cst_37 = arith.constant 1.000000e+00 : f32
    %199 = vector.broadcast %cst_37 : f32 to vector<2x80xf32>
    %200 = arith.addf %199, %198 : vector<2x80xf32>
    %201 = arith.divf %199, %200 : vector<2x80xf32>
    %202 = math.tanh %196 : vector<2x80xf32>
    %203 = vector.extract_strided_slice %201 {offsets = [0, 0], sizes = [2, 20], strides = [1, 1]} : vector<2x80xf32> to vector<2x20xf32>
    %204 = vector.extract_strided_slice %201 {offsets = [0, 20], sizes = [2, 20], strides = [1, 1]} : vector<2x80xf32> to vector<2x20xf32>
    %205 = vector.extract_strided_slice %202 {offsets = [0, 40], sizes = [2, 20], strides = [1, 1]} : vector<2x80xf32> to vector<2x20xf32>
    %206 = vector.extract_strided_slice %201 {offsets = [0, 60], sizes = [2, 20], strides = [1, 1]} : vector<2x80xf32> to vector<2x20xf32>
    %207 = arith.mulf %204, %173 : vector<2x20xf32>
    %208 = arith.mulf %203, %205 : vector<2x20xf32>
    %209 = arith.addf %207, %208 : vector<2x20xf32>
    %210 = math.tanh %209 : vector<2x20xf32>
    %211 = arith.mulf %206, %210 : vector<2x20xf32>
    %212 = tpu.concatenate %211, %193 in 1 : vector<2x20xf32>, vector<2x20xf32> -> vector<2x40xf32>
    %cst_38 = arith.constant dense<0.000000e+00> : vector<2x80xf32>
    %213 = tpu.matmul %212, %1, %cst_38 {dimension_numbers = #tpu.dot_dimension_numbers<[1], [0], [0], [1], [0, 0, 1, 1], [], []>} : vector<2x40xf32>, vector<40x80xf32>, vector<2x80xf32> -> vector<2x80xf32>
    %214 = arith.addf %213, %4 : vector<2x80xf32>
    %215 = arith.negf %214 : vector<2x80xf32>
    %216 = math.exp %215 : vector<2x80xf32>
    %cst_39 = arith.constant 1.000000e+00 : f32
    %217 = vector.broadcast %cst_39 : f32 to vector<2x80xf32>
    %218 = arith.addf %217, %216 : vector<2x80xf32>
    %219 = arith.divf %217, %218 : vector<2x80xf32>
    %220 = math.tanh %214 : vector<2x80xf32>
    %221 = vector.extract_strided_slice %219 {offsets = [0, 0], sizes = [2, 20], strides = [1, 1]} : vector<2x80xf32> to vector<2x20xf32>
    %222 = vector.extract_strided_slice %219 {offsets = [0, 20], sizes = [2, 20], strides = [1, 1]} : vector<2x80xf32> to vector<2x20xf32>
    %223 = vector.extract_strided_slice %220 {offsets = [0, 40], sizes = [2, 20], strides = [1, 1]} : vector<2x80xf32> to vector<2x20xf32>
    %224 = vector.extract_strided_slice %219 {offsets = [0, 60], sizes = [2, 20], strides = [1, 1]} : vector<2x80xf32> to vector<2x20xf32>
    %225 = arith.mulf %222, %191 : vector<2x20xf32>
    %226 = arith.mulf %221, %223 : vector<2x20xf32>
    %227 = arith.addf %225, %226 : vector<2x20xf32>
    %228 = math.tanh %227 : vector<2x20xf32>
    %229 = arith.mulf %224, %228 : vector<2x20xf32>
    %230 = vector.extract_strided_slice %12 {offsets = [12, 0], sizes = [2, 80], strides = [1, 1]} : vector<16x80xf32> to vector<2x80xf32>
    %cst_40 = arith.constant dense<0.000000e+00> : vector<2x80xf32>
    %231 = tpu.matmul %211, %0, %cst_40 {dimension_numbers = #tpu.dot_dimension_numbers<[1], [0], [0], [1], [0, 0, 1, 1], [], []>} : vector<2x20xf32>, vector<20x80xf32>, vector<2x80xf32> -> vector<2x80xf32>
    %232 = arith.addf %230, %231 : vector<2x80xf32>
    %233 = arith.negf %232 : vector<2x80xf32>
    %234 = math.exp %233 : vector<2x80xf32>
    %cst_41 = arith.constant 1.000000e+00 : f32
    %235 = vector.broadcast %cst_41 : f32 to vector<2x80xf32>
    %236 = arith.addf %235, %234 : vector<2x80xf32>
    %237 = arith.divf %235, %236 : vector<2x80xf32>
    %238 = math.tanh %232 : vector<2x80xf32>
    %239 = vector.extract_strided_slice %237 {offsets = [0, 0], sizes = [2, 20], strides = [1, 1]} : vector<2x80xf32> to vector<2x20xf32>
    %240 = vector.extract_strided_slice %237 {offsets = [0, 20], sizes = [2, 20], strides = [1, 1]} : vector<2x80xf32> to vector<2x20xf32>
    %241 = vector.extract_strided_slice %238 {offsets = [0, 40], sizes = [2, 20], strides = [1, 1]} : vector<2x80xf32> to vector<2x20xf32>
    %242 = vector.extract_strided_slice %237 {offsets = [0, 60], sizes = [2, 20], strides = [1, 1]} : vector<2x80xf32> to vector<2x20xf32>
    %243 = arith.mulf %240, %209 : vector<2x20xf32>
    %244 = arith.mulf %239, %241 : vector<2x20xf32>
    %245 = arith.addf %243, %244 : vector<2x20xf32>
    %246 = math.tanh %245 : vector<2x20xf32>
    %247 = arith.mulf %242, %246 : vector<2x20xf32>
    %248 = tpu.concatenate %247, %229 in 1 : vector<2x20xf32>, vector<2x20xf32> -> vector<2x40xf32>
    %cst_42 = arith.constant dense<0.000000e+00> : vector<2x80xf32>
    %249 = tpu.matmul %248, %1, %cst_42 {dimension_numbers = #tpu.dot_dimension_numbers<[1], [0], [0], [1], [0, 0, 1, 1], [], []>} : vector<2x40xf32>, vector<40x80xf32>, vector<2x80xf32> -> vector<2x80xf32>
    %250 = arith.addf %249, %4 : vector<2x80xf32>
    %251 = arith.negf %250 : vector<2x80xf32>
    %252 = math.exp %251 : vector<2x80xf32>
    %cst_43 = arith.constant 1.000000e+00 : f32
    %253 = vector.broadcast %cst_43 : f32 to vector<2x80xf32>
    %254 = arith.addf %253, %252 : vector<2x80xf32>
    %255 = arith.divf %253, %254 : vector<2x80xf32>
    %256 = math.tanh %250 : vector<2x80xf32>
    %257 = vector.extract_strided_slice %255 {offsets = [0, 0], sizes = [2, 20], strides = [1, 1]} : vector<2x80xf32> to vector<2x20xf32>
    %258 = vector.extract_strided_slice %255 {offsets = [0, 20], sizes = [2, 20], strides = [1, 1]} : vector<2x80xf32> to vector<2x20xf32>
    %259 = vector.extract_strided_slice %256 {offsets = [0, 40], sizes = [2, 20], strides = [1, 1]} : vector<2x80xf32> to vector<2x20xf32>
    %260 = vector.extract_strided_slice %255 {offsets = [0, 60], sizes = [2, 20], strides = [1, 1]} : vector<2x80xf32> to vector<2x20xf32>
    %261 = arith.mulf %258, %227 : vector<2x20xf32>
    %262 = arith.mulf %257, %259 : vector<2x20xf32>
    %263 = arith.addf %261, %262 : vector<2x20xf32>
    %264 = math.tanh %263 : vector<2x20xf32>
    %265 = arith.mulf %260, %264 : vector<2x20xf32>
    %266 = vector.extract_strided_slice %12 {offsets = [14, 0], sizes = [2, 80], strides = [1, 1]} : vector<16x80xf32> to vector<2x80xf32>
    %cst_44 = arith.constant dense<0.000000e+00> : vector<2x80xf32>
    %267 = tpu.matmul %247, %0, %cst_44 {dimension_numbers = #tpu.dot_dimension_numbers<[1], [0], [0], [1], [0, 0, 1, 1], [], []>} : vector<2x20xf32>, vector<20x80xf32>, vector<2x80xf32> -> vector<2x80xf32>
    %268 = arith.addf %266, %267 : vector<2x80xf32>
    %269 = arith.negf %268 : vector<2x80xf32>
    %270 = math.exp %269 : vector<2x80xf32>
    %cst_45 = arith.constant 1.000000e+00 : f32
    %271 = vector.broadcast %cst_45 : f32 to vector<2x80xf32>
    %272 = arith.addf %271, %270 : vector<2x80xf32>
    %273 = arith.divf %271, %272 : vector<2x80xf32>
    %274 = math.tanh %268 : vector<2x80xf32>
    %275 = vector.extract_strided_slice %273 {offsets = [0, 0], sizes = [2, 20], strides = [1, 1]} : vector<2x80xf32> to vector<2x20xf32>
    %276 = vector.extract_strided_slice %273 {offsets = [0, 20], sizes = [2, 20], strides = [1, 1]} : vector<2x80xf32> to vector<2x20xf32>
    %277 = vector.extract_strided_slice %274 {offsets = [0, 40], sizes = [2, 20], strides = [1, 1]} : vector<2x80xf32> to vector<2x20xf32>
    %278 = vector.extract_strided_slice %273 {offsets = [0, 60], sizes = [2, 20], strides = [1, 1]} : vector<2x80xf32> to vector<2x20xf32>
    %279 = arith.mulf %276, %245 : vector<2x20xf32>
    %280 = arith.mulf %275, %277 : vector<2x20xf32>
    %281 = arith.addf %279, %280 : vector<2x20xf32>
    %282 = math.tanh %281 : vector<2x20xf32>
    %283 = arith.mulf %278, %282 : vector<2x20xf32>
    %284 = tpu.concatenate %283, %265 in 1 : vector<2x20xf32>, vector<2x20xf32> -> vector<2x40xf32>
    %cst_46 = arith.constant dense<0.000000e+00> : vector<2x80xf32>
    %285 = tpu.matmul %284, %1, %cst_46 {dimension_numbers = #tpu.dot_dimension_numbers<[1], [0], [0], [1], [0, 0, 1, 1], [], []>} : vector<2x40xf32>, vector<40x80xf32>, vector<2x80xf32> -> vector<2x80xf32>
    %286 = arith.addf %285, %4 : vector<2x80xf32>
    %287 = arith.negf %286 : vector<2x80xf32>
    %288 = math.exp %287 : vector<2x80xf32>
    %cst_47 = arith.constant 1.000000e+00 : f32
    %289 = vector.broadcast %cst_47 : f32 to vector<2x80xf32>
    %290 = arith.addf %289, %288 : vector<2x80xf32>
    %291 = arith.divf %289, %290 : vector<2x80xf32>
    %292 = math.tanh %286 : vector<2x80xf32>
    %293 = vector.extract_strided_slice %291 {offsets = [0, 0], sizes = [2, 20], strides = [1, 1]} : vector<2x80xf32> to vector<2x20xf32>
    %294 = vector.extract_strided_slice %291 {offsets = [0, 20], sizes = [2, 20], strides = [1, 1]} : vector<2x80xf32> to vector<2x20xf32>
    %295 = vector.extract_strided_slice %292 {offsets = [0, 40], sizes = [2, 20], strides = [1, 1]} : vector<2x80xf32> to vector<2x20xf32>
    %296 = vector.extract_strided_slice %291 {offsets = [0, 60], sizes = [2, 20], strides = [1, 1]} : vector<2x80xf32> to vector<2x20xf32>
    %297 = arith.mulf %294, %263 : vector<2x20xf32>
    %298 = arith.mulf %293, %295 : vector<2x20xf32>
    %299 = arith.addf %297, %298 : vector<2x20xf32>
    %300 = math.tanh %299 : vector<2x20xf32>
    %301 = arith.mulf %296, %300 : vector<2x20xf32>
    %302 = tpu.concatenate %49, %85, %121, %157, %193, %229, %265, %301 in 0 : vector<2x20xf32>, vector<2x20xf32>, vector<2x20xf32>, vector<2x20xf32>, vector<2x20xf32>, vector<2x20xf32>, vector<2x20xf32>, vector<2x20xf32> -> vector<16x20xf32>
    %cst_48 = arith.constant dense<0.000000e+00> : vector<16x3xf32>
    %303 = tpu.matmul %302, %5, %cst_48 {dimension_numbers = #tpu.dot_dimension_numbers<[1], [0], [0], [1], [0, 0, 1, 1], [], []>} : vector<16x20xf32>, vector<20x3xf32>, vector<16x3xf32> -> vector<16x3xf32>
    %304 = vector.broadcast %6 : vector<1x3xf32> to vector<16x3xf32>
    %305 = arith.addf %303, %304 : vector<16x3xf32>
    %c0_49 = arith.constant 0 : index
    %c0_50 = arith.constant 0 : index
    %306 = vector.load %arg8[%c0_49, %c0_50] : memref<16x3xf32, #tpu.memory_space<vmem>>, vector<16x3xf32>
    tpu.vector_store %arg8[%c0_49, %c0_50], %305 {strides = array<i32>} : memref<16x3xf32, #tpu.memory_space<vmem>>, vector<16x3xf32>,
    return
  }
}

</mosaic_0001>

<bundles_post_ra>
// kernel: lstm_forward.1
= control target key start
LH: loop header
LB: loop body
LE: loop exit
PB: predicated region body
PF: predicated region fallthrough
CT: control target
= control target key end

     0   :  { %13 = vsyncpa [#allocation3], 0  ;;  %s3018_s0 = inlined_call_operand.vmem [shape: f32[16,5], index: 0, kind: input, shape index: {}]   ;;  %s3019_s1 = inlined_call_operand.hbm [shape: f32[5,80], index: 1, kind: input, shape index: {}]   ;;  %s3020_s2 = inlined_call_operand.vmem [shape: f32[20,80], index: 2, kind: input, shape index: {}]   ;;  %s3021_s3 = inlined_call_operand.hbm [shape: f32[1,80], index: 3, kind: input, shape index: {}]   ;;  %s3022_s4 = inlined_call_operand.vmem [shape: f32[40,80], index: 4, kind: input, shape index: {}]   ;;  %s3023_s5 = inlined_call_operand.hbm [shape: f32[1,80], index: 5, kind: input, shape index: {}]   ;;  %s3024_s6 = inlined_call_operand.vmem [shape: f32[20,3], index: 6, kind: input, shape index: {}]   ;;  %s3025_s7 = inlined_call_operand.vmem [shape: f32[1,3], index: 7, kind: input, shape index: {}]   ;;  %s3026_s8 = inlined_call_operand.vmem [shape: f32[16,3], index: 8, kind: output, shape index: {}]  }
   0x1   :  { %14 = vsyncpa [#allocation5], 0  ;;  %s2524_s27 = smov [#allocation4]   ;;  %s2525_s29 = smov [#allocation2]  }
   0x2   :  { %s35_s28 = sshll.u32 %s2524_s27, 4  ;;  %s23_s30 = sshll.u32 %s2525_s29, 4  ;;  %s36_s28 = int_to_ptr.vmem [resolvable:$true] %s35_s28  ;;  %s24_s30 = int_to_ptr.vmem [resolvable:$true] %s23_s30 }
   0x3   :  { %s2468_s9 = scalar_lea.vmem %s36_s28, 16  ;;  %s2472_s10 = scalar_lea.vmem %s36_s28, 32 }
   0x4   :  { %p2469_p0 = scmp.ne.s32.totalorder %s36_s28, %s2468_s9  ;;  %p2473_p1 = scmp.lt.s32.totalorder %s36_s28, %s36_s28 }
   0x5   :  { %p2474_p2 = scmp.lt.s32.totalorder %s2472_s10, %s2468_s9 }
   0x7   :  { %p2475_p3 = por %p2474_p2, %p2473_p1 }
   0x9   :  { %p2476_p4 = pnand %p2475_p3, %p2469_p0 }
   0xb   :  { %2479 = shalt.err (!%p2476_p4)
}
   0xc   :  { %38 = dma.hbm_to_vmem [thread:$0]  %s3021_s3, 16, %s36_s28, [#allocation5]  }
   0xd   :  { %s2488_s13 = scalar_lea.vmem %s24_s30, 128  ;;  %p2493_p6 = scmp.lt.s32.totalorder %s24_s30, %s24_s30 }
   0xe   :  { %p2489_p5 = scmp.ne.s32.totalorder %s24_s30, %s2488_s13  ;;  %p2494_p7 = scmp.lt.s32.totalorder %s2488_s13, %s2488_s13 }
  0x10   :  { %p2495_p8 = por %p2494_p7, %p2493_p6 }
  0x12   :  { %p2496_p9 = pnand %p2495_p8, %p2489_p5 }
  0x14   :  { %2499 = shalt.err (!%p2496_p9)
}
  0x15   :  { %26 = dma.hbm_to_vmem [thread:$0]  %s3019_s1, 128, %s24_s30, [#allocation3]  }
  0x16   :  { %s2526_s16 = smov [#allocation6]  }
  0x17   :  { %s47_s17 = sshll.u32 %s2526_s16, 4  ;;  %s48_s17 = int_to_ptr.vmem [resolvable:$true] %s47_s17 }
  0x18   :  { %s2508_s18 = scalar_lea.vmem %s48_s17, 16  ;;  %s2512_s19 = scalar_lea.vmem %s48_s17, 32 }
  0x19   :  { %p2509_p10 = scmp.ne.s32.totalorder %s48_s17, %s2508_s18  ;;  %p2513_p11 = scmp.lt.s32.totalorder %s48_s17, %s48_s17 }
  0x1a   :  { %p2514_p12 = scmp.lt.s32.totalorder %s2512_s19, %s2508_s18 }
  0x1c   :  { %p2515_p13 = por %p2514_p12, %p2513_p11 }
  0x1e   :  { %p2516_p0 = pnand %p2515_p13, %p2509_p10 }
  0x20   :  { %2519 = shalt.err (!%p2516_p0)
}
  0x21   :  { %50 = dma.hbm_to_vmem [thread:$0]  %s3023_s5, 16, %s48_s17, [#allocation5]  }
  0x22   :  { %2520 = dma.done.wait [#allocation3], 128  }
  0x23   :  { %2521 = vsyncadd [#allocation3], 4294967168 }
  0x24   :  { %2522 = dma.done.wait [#allocation5], 32  }
  0x25   :  { %2523 = vsyncadd [#allocation5], 4294967264  ;;  %v2527_v0 = vmov 0.0   ;;  %vm2528_vm0 = vmmov 0   ;;  %vm100_vm1 = vcmask 1044480   ;;  %vm93_vm2 = vcmask 39936  }
  0x26   :  { %2146 = vmatprep.subr.mxu0 %v2527_v0  ;;  %2156 = vmatprep.mubr.msk.f32.mxu0 %vm2528_vm0, %v2527_v0  ;;  %v85_v1 = vld [vmem:[#allocation2] sm:$0x1f]  ;;  %v84_v3 = vld [vmem:[%s3018_s0 + $0x8] sm:$0xff]  ;;  %v2599_v4 = vld [vmem:[%s3020_s2 + $0x10] sm:$0xf]  ;;  %vm183_vm3 = vcmask 1043456  }
  0x27   :  { %v83_v2 = vld [vmem:[%s3018_s0] sm:$0xff]  ;;  %2132 = vmatprep.subr.msk.mxu1 %vm100_vm1, %v85_v1  ;;  %v2605_v5 = vld [vmem:[%s3020_s2 + $0x8] sm:$0xff]  ;;  %s2530_s28 = smov 20   ;;  %v2649_v26 = vld [vmem:[%s3022_s4 + $0x18] sm:$0xff]  ;;  %s2531_s15 = smov 40   ;;  %vm179_vm4 = vcmask 162816  }
  0x28   :  { %2134 = vmatprep.mubr.msk.f32.mxu1 %vm93_vm2, %v83_v2  ;;  %2133 = vmatpush3.msk.msra.mxu1 %vm100_vm1, %v85_v1  ;;  %v2615_v6 = vld [vmem:[%s3020_s2] sm:$0xff]  ;;  %v1997_v7 = vld [vmem:[#allocation4] ss:$0 sm:$0xff]  ;;  %s2529_s2 = smov 88   ;;  %v2656_v27 = vld [vmem:[%s3022_s4 + $0x10] sm:$0xff]  ;;  %s2532_s18 = smov 68  }
  0x29   :  { %2135 = vmatmul.mubr.msk.f32.vlgmr.msra.gmra.mxu1 %vm93_vm2, %v84_v3  ;;  %2137 = vmatprep.subr.mxu1 %v2527_v0  ;;  %v2644_v25 = vld [vmem:[%s3022_s4 + $0x20] sm:$0xff]  ;;  %v2663_v28 = vld [vmem:[%s3022_s4 + $0x8] sm:$0xff]  ;;  %vm287_vm5 = vcmask 326656   ;;  %vm1885_vm6 = vcmask 1041408   ;;  %vm1888_vm7 = vcmask 1045504   ;;  %vm1987_vm8 = vcmask 23552  }
  0x2a   :  { %2138 = vmatpush3.msk.msra.mxu1 %vm183_vm3, %v2599_v4  ;;  %2143 = vmatprep.mubr.msk.f32.mxu1 %vm2528_vm0, %v2527_v0  ;;  %v2673_v30 = vld [vmem:[%s3022_s4] sm:$0xff]  ;;  %v2702_v35 = vld [vmem:[#allocation6] ss:$0 sm:$0xff] }
  0x2b   :  { %2139 = vmatprep.subr.mxu1 %v2527_v0  ;;  %2147 = vmatpush3.msra.mxu0 %v2644_v25 }
  0x2c   :  { %2140 = vmatpush3.msra.mxu1 %v2605_v5  ;;  %2148 = vmatprep.subr.mxu0 %v2527_v0 }
  0x2d   :  { %2141 = vmatprep.subr.mxu1 %v2527_v0  ;;  %2149 = vmatpush3.msra.mxu0 %v2649_v26 }
  0x2e   :  { %2142 = vmatpush3.msra.mxu1 %v2615_v6  ;;  %2150 = vmatprep.subr.mxu0 %v2527_v0 }
  0x2f   :  { %2144 = vmatmul.mubr.f32.vlgmr.msra.gmra.mxu1 %v2527_v0  ;;  %2159 = vmatprep.subr.mxu1 %v2527_v0 }
  0x30   :  { %2160 = vmatpush3.msk.msra.mxu1 %vm183_vm3, %v2599_v4  ;;  %2165 = vmatprep.mubr.msk.f32.mxu1 %vm2528_vm0, %v2527_v0 }
  0x31   :  { %2161 = vmatprep.subr.mxu1 %v2527_v0  ;;  %2151 = vmatpush3.msra.mxu0 %v2656_v27 }
  0x32   :  { %2162 = vmatpush3.msra.mxu1 %v2605_v5  ;;  %2152 = vmatprep.subr.mxu0 %v2527_v0 }
  0x33   :  { %2163 = vmatprep.subr.mxu1 %v2527_v0  ;;  %2153 = vmatpush3.msra.mxu0 %v2663_v28 }
  0x34   :  { %2164 = vmatpush3.msra.mxu1 %v2615_v6  ;;  %2154 = vmatprep.subr.mxu0 %v2527_v0 }
  0x35   :  { %2181 = vmatprep.subr.mxu1 %v2527_v0  ;;  %2155 = vmatpush3.msra.mxu0 %v2673_v30 }
  0x36   :  { %2168 = vmatprep.subr.mxu0 %v2527_v0 }
  0xe9   :  { %v2136_v8 = vpop.f32.mrf.mxu1 }
  0xea   :  { %v2631_v9 = vadd.f32 %v2136_v8, %v1997_v7 }
  0xeb   :  { %v170_v10 = vpop.f32.mrf.mxu1 }
  0xec   :  { %v2633_v11 = vadd.f32 %v1997_v7, %v170_v10 }
  0xef   :  { %v253_v12 = vpop.f32.mrf.mxu1 }
  0xf0   :  { %v257_v13 = vadd.f32 %v253_v12, %v2633_v11 }
  0xf1   :  { %v2145_v14 = vpop.f32.mrf.mxu1 }
  0xf2   :  { %2331 = vtanh.f32 %v257_v13  ;;  %v2002_v16 = vmul.f32 -1.442695, %v257_v13 }
  0xf4   :  { %2333 = vpow2.f32 %v2002_v16 }
  0xff   :  { %v2332_v15 = vpop.eup %2331 }
 0x100   :  { %267 = vrot.lane.b32.xlu0 %v2332_v15, %s2529_s2 }
 0x101   :  { %v2334_v17 = vpop.eup %2333 }
 0x102   :  { %v261_v18 = vadd.f32 1.0, %v2334_v17 }
 0x104   :  { %2335 = vrcp.f32 %v261_v18 }
 0x111   :  { %v2336_v19 = vpop.eup %2335 }
 0x112   :  { %v265_v22 = vmul.f32 0.0, %v2336_v19 }
 0x172   :  { %v268_v20 = vpop.permute.xlu0 %267 }
 0x173   :  { %v270_v21 = vmul.f32 %v2336_v19, %v268_v20 }
 0x175   :  { %272 = vrot.lane.b32.xlu0 %v270_v21, %s2530_s28 }
 0x1e7   :  { %v273_v23 = vpop.permute.xlu0 %272 }
 0x1e8   :  { %v2638_v24 = vadd.f32 %v273_v23, %v265_v22 }
 0x1ea   :  { %2337 = vtanh.f32 %v2638_v24  ;;  %v469_v57 = vrot.slane %v2638_v24, 6 }
 0x1f7   :  { %v2338_v29 = vpop.eup %2337 }
 0x1f8   :  { %278 = vrot.lane.b32.xlu1 %v2338_v29, %s2531_s15 }
 0x26a   :  { %v279_v31 = vpop.permute.xlu1 %278 }
 0x26b   :  { %v281_v32 = vmul.f32 %v2336_v19, %v279_v31 }
 0x26d   :  { %283 = vrot.lane.b32.xlu1 %v281_v32, %s2532_s18 }
 0x2df   :  { %v284_v33 = vpop.permute.xlu1 %283 }
 0x2e0   :  { %v286_v34 = vsel %vm179_vm4, %v284_v33, 0.0  ;;  %2166 = vmatmul.mubr.msk.f32.vlgmr.msra.gmra.mxu1 %vm179_vm4, %v284_v33 }
 0x2e1   :  { %2157 = vmatmul.mubr.msk.f32.vlgmr.msra.gmra.mxu0 %vm287_vm5, %v286_v34  ;;  %2182 = vmatpush3.msk.msra.mxu1 %vm183_vm3, %v2599_v4 }
 0x2e2   :  { %2169 = vmatpush3.msra.mxu0 %v2644_v25  ;;  %2183 = vmatprep.subr.mxu1 %v2527_v0 }
 0x2e3   :  { %2170 = vmatprep.subr.mxu0 %v2527_v0  ;;  %2184 = vmatpush3.msra.mxu1 %v2605_v5 }
 0x2e4   :  { %2171 = vmatpush3.msra.mxu0 %v2649_v26  ;;  %2185 = vmatprep.subr.mxu1 %v2527_v0 }
 0x2e5   :  { %2172 = vmatprep.subr.mxu0 %v2527_v0  ;;  %2178 = vmatprep.mubr.msk.f32.mxu0 %vm2528_vm0, %v2527_v0 }
 0x2e6   :  { %2173 = vmatpush3.msra.mxu0 %v2656_v27  ;;  %2186 = vmatpush3.msra.mxu1 %v2615_v6 }
 0x2e7   :  { %2174 = vmatprep.subr.mxu0 %v2527_v0  ;;  %2187 = vmatprep.mubr.msk.f32.mxu1 %vm2528_vm0, %v2527_v0 }
 0x2e8   :  { %2175 = vmatpush3.msra.mxu0 %v2663_v28  ;;  %2190 = vmatprep.subr.mxu1 %v2527_v0 }
 0x2e9   :  { %2176 = vmatprep.subr.mxu0 %v2527_v0 }
 0x2ea   :  { %2177 = vmatpush3.msra.mxu0 %v2673_v30 }
 0x2eb   :  { %2203 = vmatprep.subr.mxu0 %v2527_v0 }
 0x3a0   :  { %v453_v36 = vpop.f32.mrf.mxu1 }
 0x3a1   :  { %v458_v37 = vrot.slane %v453_v36, 6  ;;  %v357_v38 = vpop.f32.mrf.mxu0 }
 0x3a2   :  { %v358_v39 = vadd.f32 %v2702_v35, %v357_v38  ;;  %v2167_v40 = vpop.f32.mrf.mxu1 }
 0x3a3   :  { %v460_v41 = vadd.f32 %v458_v37, %v2633_v11  ;;  %v2158_v42 = vpop.f32.mrf.mxu0 }
 0x3a4   :  { %2339 = vtanh.f32 %v358_v39  ;;  %v2004_v45 = vmul.f32 -1.442695, %v358_v39 }
 0x3a5   :  { %2341 = vtanh.f32 %v460_v41  ;;  %v2007_v46 = vmul.f32 -1.442695, %v460_v41 }
 0x3a6   :  { %2343 = vpow2.f32 %v2004_v45 }
 0x3a7   :  { %2345 = vpow2.f32 %v2007_v46 }
 0x3b1   :  { %v2340_v43 = vpop.eup %2339 }
 0x3b2   :  { %v2342_v44 = vpop.eup %2341  ;;  %370 = vrot.lane.b32.xlu0 %v2340_v43, %s2529_s2 }
 0x3b3   :  { %473 = vrot.lane.b32.xlu1 %v2342_v44, %s2529_s2  ;;  %v2344_v47 = vpop.eup %2343 }
 0x3b4   :  { %v2346_v48 = vpop.eup %2345  ;;  %v364_v49 = vadd.f32 1.0, %v2344_v47 }
 0x3b5   :  { %v464_v50 = vadd.f32 1.0, %v2346_v48 }
 0x3b6   :  { %2347 = vrcp.f32 %v364_v49 }
 0x3b7   :  { %2349 = vrcp.f32 %v464_v50 }
 0x3c3   :  { %v2348_v51 = vpop.eup %2347 }
 0x3c4   :  { %v2350_v53 = vpop.eup %2349  ;;  %v368_v58 = vmul.f32 0.0, %v2348_v51 }
 0x3c5   :  { %v471_v60 = vmul.f32 %v2350_v53, %v469_v57 }
 0x424   :  { %v371_v52 = vpop.permute.xlu0 %370 }
 0x425   :  { %v373_v54 = vmul.f32 %v2348_v51, %v371_v52  ;;  %v474_v55 = vpop.permute.xlu1 %473 }
 0x426   :  { %v476_v56 = vmul.f32 %v2350_v53, %v474_v55 }
 0x427   :  { %375 = vrot.lane.b32.xlu0 %v373_v54, %s2530_s28 }
 0x428   :  { %478 = vrot.lane.b32.xlu1 %v476_v56, %s2530_s28 }
 0x499   :  { %v376_v59 = vpop.permute.xlu0 %375 }
 0x49a   :  { %v2711_v61 = vadd.f32 %v376_v59, %v368_v58  ;;  %v479_v62 = vpop.permute.xlu1 %478 }
 0x49b   :  { %v2713_v63 = vadd.f32 %v479_v62, %v471_v60 }
 0x49c   :  { %2351 = vtanh.f32 %v2711_v61 }
 0x49d   :  { %2353 = vtanh.f32 %v2713_v63  ;;  %v683_v47 = vrot.slane %v2713_v63, 6 }
 0x4a9   :  { %v2352_v1 = vpop.eup %2351 }
 0x4aa   :  { %v2354_v2 = vpop.eup %2353  ;;  %381 = vrot.lane.b32.xlu0 %v2352_v1, %s2531_s15 }
 0x4ab   :  { %484 = vrot.lane.b32.xlu1 %v2354_v2, %s2531_s15 }
 0x51c   :  { %v382_v3 = vpop.permute.xlu0 %381 }
 0x51d   :  { %v2719_v7 = vmul.f32 %v2348_v51, %v382_v3  ;;  %v485_v8 = vpop.permute.xlu1 %484 }
 0x51e   :  { %v487_v10 = vmul.f32 %v2350_v53, %v485_v8 }
 0x51f   :  { %v493_v12 = vrot.slane %v2719_v7, 6 }
 0x520   :  { %489 = vrot.lane.b32.xlu0 %v487_v10, %s2532_s18  ;;  %v596_v13 = vrot.slane %v487_v10, 2 }
 0x521   :  { %494 = vrot.lane.b32.xlu1 %v493_v12, %s2529_s2 }
 0x524   :  { %597 = vrot.lane.b32.xlu0 %v596_v13, %s2532_s18 }
 0x592   :  { %v490_v14 = vpop.permute.xlu0 %489 }
 0x593   :  { %v495_v15 = vpop.permute.xlu1 %494 }
 0x594   :  { %v497_v16 = vsel %vm179_vm4, %v490_v14, %v495_v15 }
 0x595   :  { %v499_v17 = vrot.slane %v497_v16, 2 }
 0x596   :  { %v598_v18 = vpop.permute.xlu0 %597 }
 0x597   :  { %2179 = vmatmul.mubr.msk.f32.vlgmr.msra.gmra.mxu0 %vm287_vm5, %v499_v17  ;;  %2188 = vmatmul.mubr.msk.f32.vlgmr.msra.gmra.mxu1 %vm179_vm4, %v598_v18 }
 0x598   :  { %2191 = vmatpush3.msra.mxu1 %v2644_v25  ;;  %2204 = vmatpush3.msk.msra.mxu0 %vm183_vm3, %v2599_v4 }
 0x599   :  { %2192 = vmatprep.subr.mxu1 %v2527_v0  ;;  %2205 = vmatprep.subr.mxu0 %v2527_v0 }
 0x59a   :  { %2193 = vmatpush3.msra.mxu1 %v2649_v26  ;;  %2206 = vmatpush3.msra.mxu0 %v2605_v5 }
 0x59b   :  { %2194 = vmatprep.subr.mxu1 %v2527_v0  ;;  %2200 = vmatprep.mubr.msk.f32.mxu1 %vm2528_vm0, %v2527_v0 }
 0x59c   :  { %2195 = vmatpush3.msra.mxu1 %v2656_v27  ;;  %2207 = vmatprep.subr.mxu0 %v2527_v0 }
 0x59d   :  { %2196 = vmatprep.subr.mxu1 %v2527_v0  ;;  %2208 = vmatpush3.msra.mxu0 %v2615_v6 }
 0x59e   :  { %2197 = vmatpush3.msra.mxu1 %v2663_v28  ;;  %2209 = vmatprep.mubr.msk.f32.mxu0 %vm2528_vm0, %v2527_v0 }
 0x59f   :  { %2198 = vmatprep.subr.mxu1 %v2527_v0  ;;  %2212 = vmatprep.subr.mxu0 %v2527_v0 }
 0x5a0   :  { %2199 = vmatpush3.msra.mxu1 %v2673_v30 }
 0x5a1   :  { %2225 = vmatprep.subr.mxu1 %v2527_v0 }
 0x657   :  { %v568_v19 = vpop.f32.mrf.mxu0  ;;  %v667_v20 = vpop.f32.mrf.mxu1 }
 0x658   :  { %v569_v21 = vadd.f32 %v2702_v35, %v568_v19  ;;  %v672_v22 = vrot.slane %v667_v20, 4 }
 0x659   :  { %v2180_v23 = vpop.f32.mrf.mxu0  ;;  %v2189_v24 = vpop.f32.mrf.mxu1 }
 0x65a   :  { %2355 = vtanh.f32 %v569_v21  ;;  %v674_v29 = vadd.f32 %v672_v22, %v2633_v11  ;;  %v2009_v33 = vmul.f32 -1.442695, %v569_v21 }
 0x65c   :  { %2357 = vtanh.f32 %v674_v29  ;;  %v2012_v34 = vmul.f32 -1.442695, %v674_v29 }
 0x65d   :  { %2359 = vpow2.f32 %v2009_v33 }
 0x65e   :  { %2361 = vpow2.f32 %v2012_v34 }
 0x667   :  { %v2356_v31 = vpop.eup %2355 }
 0x668   :  { %581 = vrot.lane.b32.xlu1 %v2356_v31, %s2529_s2 }
 0x669   :  { %v2358_v32 = vpop.eup %2357 }
 0x66a   :  { %687 = vrot.lane.b32.xlu0 %v2358_v32, %s2529_s2  ;;  %v2360_v36 = vpop.eup %2359 }
 0x66b   :  { %v2362_v37 = vpop.eup %2361  ;;  %v575_v38 = vadd.f32 1.0, %v2360_v36 }
 0x66c   :  { %v678_v39 = vadd.f32 1.0, %v2362_v37 }
 0x66d   :  { %2363 = vrcp.f32 %v575_v38 }
 0x66e   :  { %2365 = vrcp.f32 %v678_v39 }
 0x67a   :  { %v2364_v40 = vpop.eup %2363 }
 0x67b   :  { %v2366_v43 = vpop.eup %2365  ;;  %v579_v46 = vmul.f32 %v2364_v40, %v2711_v61 }
 0x67c   :  { %v685_v50 = vmul.f32 %v2366_v43, %v683_v47 }
 0x6da   :  { %v582_v41 = vpop.permute.xlu1 %581 }
 0x6db   :  { %v584_v42 = vmul.f32 %v2364_v40, %v582_v41 }
 0x6dc   :  { %v688_v44 = vpop.permute.xlu0 %687 }
 0x6dd   :  { %586 = vrot.lane.b32.xlu1 %v584_v42, %s2530_s28  ;;  %v690_v45 = vmul.f32 %v2366_v43, %v688_v44 }
 0x6df   :  { %692 = vrot.lane.b32.xlu0 %v690_v45, %s2530_s28 }
 0x74f   :  { %v587_v48 = vpop.permute.xlu1 %586 }
 0x750   :  { %v2757_v49 = vadd.f32 %v587_v48, %v579_v46 }
 0x751   :  { %v693_v51 = vpop.permute.xlu0 %692 }
 0x752   :  { %2367 = vtanh.f32 %v2757_v49  ;;  %v2760_v52 = vadd.f32 %v693_v51, %v685_v50 }
 0x754   :  { %2369 = vtanh.f32 %v2760_v52  ;;  %v897_v36 = vrot.slane %v2760_v52, 6 }
 0x75f   :  { %v2368_v53 = vpop.eup %2367 }
 0x760   :  { %592 = vrot.lane.b32.xlu1 %v2368_v53, %s2531_s15 }
 0x761   :  { %v2370_v54 = vpop.eup %2369 }
 0x762   :  { %698 = vrot.lane.b32.xlu0 %v2370_v54, %s2531_s15 }
 0x7d2   :  { %v593_v55 = vpop.permute.xlu1 %592 }
 0x7d3   :  { %v2765_v56 = vmul.f32 %v2364_v40, %v593_v55 }
 0x7d4   :  { %v699_v58 = vpop.permute.xlu0 %698 }
 0x7d5   :  { %v707_v57 = vrot.slane %v2765_v56, 4  ;;  %v701_v59 = vmul.f32 %v2366_v43, %v699_v58  ;;  %v1872_v44 = vrot.slane %v2765_v56, 6 }
 0x7d7   :  { %708 = vrot.lane.b32.xlu0 %v707_v57, %s2529_s2  ;;  %703 = vrot.lane.b32.xlu1 %v701_v59, %s2532_s18  ;;  %v810_v60 = vrot.slane %v701_v59, 4  ;;  %v1886_v51 = vsel %vm1885_vm6, %v2719_v7, %v1872_v44 }
 0x7db   :  { %811 = vrot.lane.b32.xlu1 %v810_v60, %s2532_s18 }
 0x849   :  { %v709_v61 = vpop.permute.xlu0 %708  ;;  %v704_v62 = vpop.permute.xlu1 %703 }
 0x84a   :  { %v711_v63 = vsel %vm179_vm4, %v704_v62, %v709_v61 }
 0x84b   :  { %v713_v1 = vrot.slane %v711_v63, 4 }
 0x84d   :  { %v812_v2 = vpop.permute.xlu1 %811  ;;  %2201 = vmatmul.mubr.msk.f32.vlgmr.msra.gmra.mxu1 %vm287_vm5, %v713_v1 }
 0x84e   :  { %2210 = vmatmul.mubr.msk.f32.vlgmr.msra.gmra.mxu0 %vm179_vm4, %v812_v2  ;;  %2226 = vmatpush3.msk.msra.mxu1 %vm183_vm3, %v2599_v4 }
 0x84f   :  { %2213 = vmatpush3.msra.mxu0 %v2644_v25  ;;  %2227 = vmatprep.subr.mxu1 %v2527_v0 }
 0x850   :  { %2214 = vmatprep.subr.mxu0 %v2527_v0  ;;  %2228 = vmatpush3.msra.mxu1 %v2605_v5 }
 0x851   :  { %2215 = vmatpush3.msra.mxu0 %v2649_v26  ;;  %2222 = vmatprep.mubr.msk.f32.mxu0 %vm2528_vm0, %v2527_v0 }
 0x852   :  { %2216 = vmatprep.subr.mxu0 %v2527_v0  ;;  %2229 = vmatprep.subr.mxu1 %v2527_v0 }
 0x853   :  { %2217 = vmatpush3.msra.mxu0 %v2656_v27  ;;  %2230 = vmatpush3.msra.mxu1 %v2615_v6 }
 0x854   :  { %2218 = vmatprep.subr.mxu0 %v2527_v0  ;;  %2231 = vmatprep.mubr.msk.f32.mxu1 %vm2528_vm0, %v2527_v0 }
 0x855   :  { %2219 = vmatpush3.msra.mxu0 %v2663_v28  ;;  %2234 = vmatprep.subr.mxu1 %v2527_v0 }
 0x856   :  { %2220 = vmatprep.subr.mxu0 %v2527_v0 }
 0x857   :  { %2221 = vmatpush3.msra.mxu0 %v2673_v30 }
 0x858   :  { %2247 = vmatprep.subr.mxu0 %v2527_v0 }
 0x90d   :  { %v782_v3 = vpop.f32.mrf.mxu1 }
 0x90e   :  { %v783_v8 = vadd.f32 %v2702_v35, %v782_v3  ;;  %v881_v10 = vpop.f32.mrf.mxu0 }
 0x90f   :  { %v886_v12 = vrot.slane %v881_v10, 2  ;;  %v2202_v13 = vpop.f32.mrf.mxu1 }
 0x910   :  { %2371 = vtanh.f32 %v783_v8  ;;  %v2211_v14 = vpop.f32.mrf.mxu0  ;;  %v2014_v18 = vmul.f32 -1.442695, %v783_v8 }
 0x911   :  { %v888_v15 = vadd.f32 %v886_v12, %v2633_v11 }
 0x913   :  { %2373 = vtanh.f32 %v888_v15  ;;  %v2017_v19 = vmul.f32 -1.442695, %v888_v15 }
 0x914   :  { %2375 = vpow2.f32 %v2014_v18 }
 0x915   :  { %2377 = vpow2.f32 %v2017_v19 }
 0x91d   :  { %v2372_v16 = vpop.eup %2371 }
 0x91e   :  { %795 = vrot.lane.b32.xlu0 %v2372_v16, %s2529_s2 }
 0x920   :  { %v2374_v17 = vpop.eup %2373 }
 0x921   :  { %901 = vrot.lane.b32.xlu1 %v2374_v17, %s2529_s2  ;;  %v2376_v20 = vpop.eup %2375 }
 0x922   :  { %v2378_v21 = vpop.eup %2377  ;;  %v789_v22 = vadd.f32 1.0, %v2376_v20 }
 0x923   :  { %v892_v23 = vadd.f32 1.0, %v2378_v21 }
 0x924   :  { %2379 = vrcp.f32 %v789_v22 }
 0x925   :  { %2381 = vrcp.f32 %v892_v23 }
 0x931   :  { %v2380_v24 = vpop.eup %2379 }
 0x932   :  { %v2382_v31 = vpop.eup %2381  ;;  %v793_v34 = vmul.f32 %v2380_v24, %v2757_v49 }
 0x933   :  { %v899_v39 = vmul.f32 %v2382_v31, %v897_v36 }
 0x990   :  { %v796_v29 = vpop.permute.xlu0 %795 }
 0x991   :  { %v798_v11 = vmul.f32 %v2380_v24, %v796_v29 }
 0x993   :  { %v902_v32 = vpop.permute.xlu1 %901  ;;  %800 = vrot.lane.b32.xlu0 %v798_v11, %s2530_s28 }
 0x994   :  { %v904_v33 = vmul.f32 %v2382_v31, %v902_v32 }
 0x996   :  { %906 = vrot.lane.b32.xlu1 %v904_v33, %s2530_s28 }
 0xa05   :  { %v801_v37 = vpop.permute.xlu0 %800 }
 0xa06   :  { %v2803_v38 = vadd.f32 %v801_v37, %v793_v34 }
 0xa08   :  { %2383 = vtanh.f32 %v2803_v38  ;;  %v907_v40 = vpop.permute.xlu1 %906 }
 0xa09   :  { %v2806_v41 = vadd.f32 %v907_v40, %v899_v39 }
 0xa0b   :  { %2385 = vtanh.f32 %v2806_v41  ;;  %v1108_v21 = vrot.slane %v2806_v41, 6 }
 0xa15   :  { %v2384_v42 = vpop.eup %2383 }
 0xa16   :  { %806 = vrot.lane.b32.xlu0 %v2384_v42, %s2531_s15 }
 0xa18   :  { %v2386_v43 = vpop.eup %2385 }
 0xa19   :  { %912 = vrot.lane.b32.xlu1 %v2386_v43, %s2531_s15 }
 0xa88   :  { %v807_v45 = vpop.permute.xlu0 %806 }
 0xa89   :  { %v809_v46 = vmul.f32 %v2380_v24, %v807_v45 }
 0xa8b   :  { %v921_v47 = vrot.slane %v809_v46, 2  ;;  %v1874_v48 = vrot.slane %v809_v46, 4  ;;  %v913_v49 = vpop.permute.xlu1 %912 }
 0xa8c   :  { %v915_v50 = vmul.f32 %v2382_v31, %v913_v49 }
 0xa8d   :  { %922 = vrot.lane.b32.xlu1 %v921_v47, %s2529_s2  ;;  %v2816_v52 = vsel %vm183_vm3, %v1886_v51, %v1874_v48 }
 0xa8e   :  { %917 = vrot.lane.b32.xlu0 %v915_v50, %s2532_s18  ;;  %v1024_v53 = vrot.slane %v915_v50, 6 }
 0xa92   :  { %1025 = vrot.lane.b32.xlu0 %v1024_v53, %s2532_s18 }
 0xaff   :  { %v923_v54 = vpop.permute.xlu1 %922 }
 0xb00   :  { %v918_v55 = vpop.permute.xlu0 %917 }
 0xb01   :  { %v925_v56 = vsel %vm179_vm4, %v918_v55, %v923_v54 }
 0xb02   :  { %v927_v57 = vrot.slane %v925_v56, 6 }
 0xb04   :  { %2223 = vmatmul.mubr.msk.f32.vlgmr.msra.gmra.mxu0 %vm287_vm5, %v927_v57  ;;  %v1026_v58 = vpop.permute.xlu0 %1025 }
 0xb05   :  { %2232 = vmatmul.mubr.msk.f32.vlgmr.msra.gmra.mxu1 %vm179_vm4, %v1026_v58  ;;  %2248 = vmatpush3.msk.msra.mxu0 %vm183_vm3, %v2599_v4 }
 0xb06   :  { %2235 = vmatpush3.msra.mxu1 %v2644_v25  ;;  %2249 = vmatprep.subr.mxu0 %v2527_v0 }
 0xb07   :  { %2236 = vmatprep.subr.mxu1 %v2527_v0  ;;  %2250 = vmatpush3.msra.mxu0 %v2605_v5 }
 0xb08   :  { %2237 = vmatpush3.msra.mxu1 %v2649_v26  ;;  %2251 = vmatprep.subr.mxu0 %v2527_v0 }
 0xb09   :  { %2238 = vmatprep.subr.mxu1 %v2527_v0  ;;  %2252 = vmatpush3.msra.mxu0 %v2615_v6 }
 0xb0a   :  { %2239 = vmatpush3.msra.mxu1 %v2656_v27  ;;  %2253 = vmatprep.mubr.msk.f32.mxu0 %vm2528_vm0, %v2527_v0 }
 0xb0b   :  { %2240 = vmatprep.subr.mxu1 %v2527_v0  ;;  %2244 = vmatprep.mubr.msk.f32.mxu1 %vm2528_vm0, %v2527_v0 }
 0xb0c   :  { %2241 = vmatpush3.msra.mxu1 %v2663_v28  ;;  %2256 = vmatprep.subr.mxu0 %v2527_v0 }
 0xb0d   :  { %2242 = vmatprep.subr.mxu1 %v2527_v0 }
 0xb0e   :  { %2243 = vmatpush3.msra.mxu1 %v2673_v30 }
 0xb0f   :  { %2269 = vmatprep.subr.mxu1 %v2527_v0 }
 0xbc4   :  { %v996_v7 = vpop.f32.mrf.mxu0 }
 0xbc5   :  { %v997_v59 = vadd.f32 %v2702_v35, %v996_v7  ;;  %v1095_v60 = vpop.f32.mrf.mxu1 }
 0xbc6   :  { %v1099_v61 = vadd.f32 %v1095_v60, %v2631_v9  ;;  %v2224_v62 = vpop.f32.mrf.mxu0 }
 0xbc7   :  { %2387 = vtanh.f32 %v997_v59  ;;  %v2233_v63 = vpop.f32.mrf.mxu1  ;;  %v2019_v3 = vmul.f32 -1.442695, %v997_v59 }
 0xbc8   :  { %2389 = vtanh.f32 %v1099_v61  ;;  %v2022_v8 = vmul.f32 -1.442695, %v1099_v61 }
 0xbc9   :  { %2391 = vpow2.f32 %v2019_v3 }
 0xbca   :  { %2393 = vpow2.f32 %v2022_v8 }
 0xbd4   :  { %v2388_v1 = vpop.eup %2387 }
 0xbd5   :  { %v2390_v2 = vpop.eup %2389  ;;  %1009 = vrot.lane.b32.xlu1 %v2388_v1, %s2529_s2 }
 0xbd6   :  { %1112 = vrot.lane.b32.xlu0 %v2390_v2, %s2529_s2  ;;  %v2392_v10 = vpop.eup %2391 }
 0xbd7   :  { %v2394_v12 = vpop.eup %2393  ;;  %v1003_v13 = vadd.f32 1.0, %v2392_v10 }
 0xbd8   :  { %v1103_v14 = vadd.f32 1.0, %v2394_v12 }
 0xbd9   :  { %2395 = vrcp.f32 %v1003_v13 }
 0xbda   :  { %2397 = vrcp.f32 %v1103_v14 }
 0xbe6   :  { %v2396_v15 = vpop.eup %2395 }
 0xbe7   :  { %v2398_v17 = vpop.eup %2397  ;;  %v1007_v22 = vmul.f32 %v2396_v15, %v2803_v38 }
 0xbe8   :  { %v1110_v24 = vmul.f32 %v2398_v17, %v1108_v21 }
 0xc47   :  { %v1010_v16 = vpop.permute.xlu1 %1009 }
 0xc48   :  { %v1012_v18 = vmul.f32 %v2396_v15, %v1010_v16  ;;  %v1113_v19 = vpop.permute.xlu0 %1112 }
 0xc49   :  { %v1115_v20 = vmul.f32 %v2398_v17, %v1113_v19 }
 0xc4a   :  { %1014 = vrot.lane.b32.xlu1 %v1012_v18, %s2530_s28 }
 0xc4b   :  { %1117 = vrot.lane.b32.xlu0 %v1115_v20, %s2530_s28 }
 0xcbc   :  { %v1015_v23 = vpop.permute.xlu1 %1014 }
 0xcbd   :  { %v2852_v29 = vadd.f32 %v1015_v23, %v1007_v22  ;;  %v1118_v11 = vpop.permute.xlu0 %1117 }
 0xcbe   :  { %v2854_v31 = vadd.f32 %v1118_v11, %v1110_v24 }
 0xcbf   :  { %2399 = vtanh.f32 %v2852_v29 }
 0xcc0   :  { %2401 = vtanh.f32 %v2854_v31  ;;  %v1317_v1 = vrot.slane %v2854_v31, 6 }
 0xccc   :  { %v2400_v32 = vpop.eup %2399 }
 0xccd   :  { %v2402_v33 = vpop.eup %2401  ;;  %1020 = vrot.lane.b32.xlu1 %v2400_v32, %s2531_s15 }
 0xcce   :  { %1123 = vrot.lane.b32.xlu0 %v2402_v33, %s2531_s15 }
 0xd3f   :  { %v1021_v34 = vpop.permute.xlu1 %1020 }
 0xd40   :  { %v1023_v36 = vmul.f32 %v2396_v15, %v1021_v34  ;;  %v1124_v37 = vpop.permute.xlu0 %1123 }
 0xd41   :  { %v1126_v38 = vmul.f32 %v2398_v17, %v1124_v37 }
 0xd42   :  { %v1876_v39 = vrot.slane %v1023_v36, 2  ;;  %1132 = vrot.lane.b32.xlu0 %v1023_v36, %s2529_s2 }
 0xd43   :  { %1128 = vrot.lane.b32.xlu1 %v1126_v38, %s2532_s18 }
 0xd44   :  { %v2864_v40 = vsel %vm1888_vm7, %v2816_v52, %v1876_v39 }
 0xdb4   :  { %v1133_v41 = vpop.permute.xlu0 %1132 }
 0xdb5   :  { %v1129_v42 = vpop.permute.xlu1 %1128 }
 0xdb6   :  { %v1135_v43 = vsel %vm179_vm4, %v1129_v42, %v1133_v41  ;;  %2254 = vmatmul.mubr.msk.f32.vlgmr.msra.gmra.mxu0 %vm179_vm4, %v1129_v42 }
 0xdb7   :  { %2245 = vmatmul.mubr.msk.f32.vlgmr.msra.gmra.mxu1 %vm287_vm5, %v1135_v43  ;;  %2257 = vmatpush3.msra.mxu0 %v2644_v25 }
 0xdb8   :  { %2258 = vmatprep.subr.mxu0 %v2527_v0  ;;  %2270 = vmatpush3.msk.msra.mxu1 %vm183_vm3, %v2599_v4 }
 0xdb9   :  { %2259 = vmatpush3.msra.mxu0 %v2649_v26  ;;  %2271 = vmatprep.subr.mxu1 %v2527_v0 }
 0xdba   :  { %2260 = vmatprep.subr.mxu0 %v2527_v0  ;;  %2272 = vmatpush3.msra.mxu1 %v2605_v5 }
 0xdbb   :  { %2261 = vmatpush3.msra.mxu0 %v2656_v27  ;;  %2273 = vmatprep.subr.mxu1 %v2527_v0 }
 0xdbc   :  { %2262 = vmatprep.subr.mxu0 %v2527_v0  ;;  %2266 = vmatprep.mubr.msk.f32.mxu0 %vm2528_vm0, %v2527_v0 }
 0xdbd   :  { %2263 = vmatpush3.msra.mxu0 %v2663_v28  ;;  %2274 = vmatpush3.msra.mxu1 %v2615_v6 }
 0xdbe   :  { %2264 = vmatprep.subr.mxu0 %v2527_v0  ;;  %2275 = vmatprep.mubr.msk.f32.mxu1 %vm2528_vm0, %v2527_v0 }
 0xdbf   :  { %2265 = vmatpush3.msra.mxu0 %v2673_v30  ;;  %2278 = vmatprep.subr.mxu1 %v2527_v0 }
 0xdc0   :  { %2291 = vmatprep.subr.mxu0 %v2527_v0 }
 0xe76   :  { %v1301_v44 = vpop.f32.mrf.mxu0 }
 0xe77   :  { %v1306_v45 = vrot.slane %v1301_v44, 6  ;;  %v1205_v46 = vpop.f32.mrf.mxu1 }
 0xe78   :  { %v1206_v47 = vadd.f32 %v2702_v35, %v1205_v46  ;;  %v2255_v48 = vpop.f32.mrf.mxu0 }
 0xe79   :  { %v1308_v49 = vadd.f32 %v1306_v45, %v2631_v9  ;;  %v2246_v50 = vpop.f32.mrf.mxu1 }
 0xe7a   :  { %2403 = vtanh.f32 %v1206_v47  ;;  %v2024_v53 = vmul.f32 -1.442695, %v1206_v47 }
 0xe7b   :  { %2405 = vtanh.f32 %v1308_v49  ;;  %v2027_v54 = vmul.f32 -1.442695, %v1308_v49 }
 0xe7c   :  { %2407 = vpow2.f32 %v2024_v53 }
 0xe7d   :  { %2409 = vpow2.f32 %v2027_v54 }
 0xe87   :  { %v2404_v51 = vpop.eup %2403 }
 0xe88   :  { %v2406_v52 = vpop.eup %2405  ;;  %1218 = vrot.lane.b32.xlu1 %v2404_v51, %s2529_s2 }
 0xe89   :  { %1321 = vrot.lane.b32.xlu0 %v2406_v52, %s2529_s2  ;;  %v2408_v55 = vpop.eup %2407 }
 0xe8a   :  { %v2410_v56 = vpop.eup %2409  ;;  %v1212_v57 = vadd.f32 1.0, %v2408_v55 }
 0xe8b   :  { %v1312_v58 = vadd.f32 1.0, %v2410_v56 }
 0xe8c   :  { %2411 = vrcp.f32 %v1212_v57 }
 0xe8d   :  { %2413 = vrcp.f32 %v1312_v58 }
 0xe99   :  { %v2412_v7 = vpop.eup %2411 }
 0xe9a   :  { %v2414_v60 = vpop.eup %2413  ;;  %v1216_v2 = vmul.f32 %v2412_v7, %v2852_v29 }
 0xe9b   :  { %v1319_v8 = vmul.f32 %v2414_v60, %v1317_v1 }
 0xefa   :  { %v1219_v59 = vpop.permute.xlu1 %1218 }
 0xefb   :  { %v1221_v61 = vmul.f32 %v2412_v7, %v1219_v59  ;;  %v1322_v62 = vpop.permute.xlu0 %1321 }
 0xefc   :  { %v1324_v63 = vmul.f32 %v2414_v60, %v1322_v62 }
 0xefd   :  { %1223 = vrot.lane.b32.xlu1 %v1221_v61, %s2530_s28 }
 0xefe   :  { %1326 = vrot.lane.b32.xlu0 %v1324_v63, %s2530_s28 }
 0xf6f   :  { %v1224_v3 = vpop.permute.xlu1 %1223 }
 0xf70   :  { %v2898_v10 = vadd.f32 %v1224_v3, %v1216_v2  ;;  %v1327_v12 = vpop.permute.xlu0 %1326 }
 0xf71   :  { %v2900_v13 = vadd.f32 %v1327_v12, %v1319_v8 }
 0xf72   :  { %2415 = vtanh.f32 %v2898_v10 }
 0xf73   :  { %2417 = vtanh.f32 %v2900_v13  ;;  %v1531_v52 = vrot.slane %v2900_v13, 6 }
 0xf7f   :  { %v2416_v14 = vpop.eup %2415 }
 0xf80   :  { %v2418_v15 = vpop.eup %2417  ;;  %1229 = vrot.lane.b32.xlu1 %v2416_v14, %s2531_s15 }
 0xf81   :  { %1332 = vrot.lane.b32.xlu0 %v2418_v15, %s2531_s15 }
 0xff2   :  { %v1230_v16 = vpop.permute.xlu1 %1229 }
 0xff3   :  { %v2906_v17 = vmul.f32 %v2412_v7, %v1230_v16  ;;  %v1333_v18 = vpop.permute.xlu0 %1332 }
 0xff4   :  { %v1335_v19 = vmul.f32 %v2414_v60, %v1333_v18 }
 0xff5   :  { %v1341_v20 = vrot.slane %v2906_v17, 6 }
 0xff6   :  { %1337 = vrot.lane.b32.xlu1 %v1335_v19, %s2532_s18  ;;  %v1444_v21 = vrot.slane %v1335_v19, 2 }
 0xff7   :  { %1342 = vrot.lane.b32.xlu0 %v1341_v20, %s2529_s2 }
 0xffa   :  { %1445 = vrot.lane.b32.xlu1 %v1444_v21, %s2532_s18 }
0x1068   :  { %v1338_v22 = vpop.permute.xlu1 %1337 }
0x1069   :  { %v1343_v23 = vpop.permute.xlu0 %1342 }
0x106a   :  { %v1345_v24 = vsel %vm179_vm4, %v1338_v22, %v1343_v23 }
0x106b   :  { %v1347_v29 = vrot.slane %v1345_v24, 2 }
0x106c   :  { %v1446_v11 = vpop.permute.xlu1 %1445 }
0x106d   :  { %2267 = vmatmul.mubr.msk.f32.vlgmr.msra.gmra.mxu0 %vm287_vm5, %v1347_v29  ;;  %2276 = vmatmul.mubr.msk.f32.vlgmr.msra.gmra.mxu1 %vm179_vm4, %v1446_v11 }
0x106e   :  { %2279 = vmatpush3.msra.mxu1 %v2644_v25  ;;  %2292 = vmatpush3.msk.msra.mxu0 %vm183_vm3, %v2599_v4 }
0x106f   :  { %2280 = vmatprep.subr.mxu1 %v2527_v0  ;;  %2293 = vmatprep.subr.mxu0 %v2527_v0 }
0x1070   :  { %2281 = vmatpush3.msra.mxu1 %v2649_v26  ;;  %2294 = vmatpush3.msra.mxu0 %v2605_v5 }
0x1071   :  { %2282 = vmatprep.subr.mxu1 %v2527_v0  ;;  %2288 = vmatprep.mubr.msk.f32.mxu1 %vm2528_vm0, %v2527_v0 }
0x1072   :  { %2283 = vmatpush3.msra.mxu1 %v2656_v27  ;;  %2295 = vmatprep.subr.mxu0 %v2527_v0 }
0x1073   :  { %2284 = vmatprep.subr.mxu1 %v2527_v0  ;;  %2296 = vmatpush3.msra.mxu0 %v2615_v6 }
0x1074   :  { %2285 = vmatpush3.msra.mxu1 %v2663_v28  ;;  %2297 = vmatprep.mubr.msk.f32.mxu0 %vm2528_vm0, %v2527_v0 }
0x1075   :  { %2286 = vmatprep.subr.mxu1 %v2527_v0  ;;  %2300 = vmatprep.subr.mxu0 %v2527_v0 }
0x1076   :  { %2287 = vmatpush3.msra.mxu1 %v2673_v30 }
0x112d   :  { %v1416_v4 = vpop.f32.mrf.mxu0  ;;  %v1515_v5 = vpop.f32.mrf.mxu1 }
0x112e   :  { %v1417_v31 = vadd.f32 %v2702_v35, %v1416_v4  ;;  %v1520_v32 = vrot.slane %v1515_v5, 4 }
0x112f   :  { %v2268_v33 = vpop.f32.mrf.mxu0  ;;  %v2277_v34 = vpop.f32.mrf.mxu1 }
0x1130   :  { %2419 = vtanh.f32 %v1417_v31  ;;  %v1522_v6 = vadd.f32 %v1520_v32, %v2631_v9  ;;  %v2029_v38 = vmul.f32 -1.442695, %v1417_v31 }
0x1132   :  { %2421 = vtanh.f32 %v1522_v6  ;;  %v2032_v39 = vmul.f32 -1.442695, %v1522_v6 }
0x1133   :  { %2423 = vpow2.f32 %v2029_v38 }
0x1134   :  { %2425 = vpow2.f32 %v2032_v39 }
0x113d   :  { %v2420_v36 = vpop.eup %2419 }
0x113e   :  { %1429 = vrot.lane.b32.xlu0 %v2420_v36, %s2529_s2 }
0x113f   :  { %v2422_v37 = vpop.eup %2421 }
0x1140   :  { %1535 = vrot.lane.b32.xlu1 %v2422_v37, %s2529_s2  ;;  %v2424_v41 = vpop.eup %2423 }
0x1141   :  { %v2426_v42 = vpop.eup %2425  ;;  %v1423_v43 = vadd.f32 1.0, %v2424_v41 }
0x1142   :  { %v1526_v44 = vadd.f32 1.0, %v2426_v42 }
0x1143   :  { %2427 = vrcp.f32 %v1423_v43 }
0x1144   :  { %2429 = vrcp.f32 %v1526_v44 }
0x1150   :  { %v2428_v45 = vpop.eup %2427 }
0x1151   :  { %v2430_v48 = vpop.eup %2429  ;;  %v1427_v51 = vmul.f32 %v2428_v45, %v2898_v10 }
0x1152   :  { %v1533_v55 = vmul.f32 %v2430_v48, %v1531_v52 }
0x11b0   :  { %v1430_v46 = vpop.permute.xlu0 %1429 }
0x11b1   :  { %v1432_v47 = vmul.f32 %v2428_v45, %v1430_v46 }
0x11b2   :  { %v1536_v49 = vpop.permute.xlu1 %1535 }
0x11b3   :  { %1434 = vrot.lane.b32.xlu0 %v1432_v47, %s2530_s28  ;;  %v1538_v50 = vmul.f32 %v2430_v48, %v1536_v49 }
0x11b5   :  { %1540 = vrot.lane.b32.xlu1 %v1538_v50, %s2530_s28 }
0x1225   :  { %v1435_v53 = vpop.permute.xlu0 %1434 }
0x1226   :  { %v2943_v54 = vadd.f32 %v1435_v53, %v1427_v51  ;;  %v2459_v53 = vld [vmem:[#allocation6] ss:$0 sm:$0xff] }
0x1227   :  { %v1541_v56 = vpop.permute.xlu1 %1540 }
0x1228   :  { %2431 = vtanh.f32 %v2943_v54  ;;  %v2946_v57 = vadd.f32 %v1541_v56, %v1533_v55 }
0x122a   :  { %2433 = vtanh.f32 %v2946_v57  ;;  %v1745_v5 = vrot.slane %v2946_v57, 6 }
0x1235   :  { %v2432_v58 = vpop.eup %2431 }
0x1236   :  { %1440 = vrot.lane.b32.xlu0 %v2432_v58, %s2531_s15 }
0x1237   :  { %v2434_v7 = vpop.eup %2433 }
0x1238   :  { %1546 = vrot.lane.b32.xlu1 %v2434_v7, %s2531_s15 }
0x12a8   :  { %v1441_v59 = vpop.permute.xlu0 %1440 }
0x12a9   :  { %v2951_v60 = vmul.f32 %v2428_v45, %v1441_v59 }
0x12aa   :  { %v1547_v62 = vpop.permute.xlu1 %1546 }
0x12ab   :  { %v1555_v61 = vrot.slane %v2951_v60, 4  ;;  %v1549_v63 = vmul.f32 %v2430_v48, %v1547_v62  ;;  %v1878_v38 = vrot.slane %v2951_v60, 6 }
0x12ad   :  { %1556 = vrot.lane.b32.xlu1 %v1555_v61, %s2529_s2  ;;  %1551 = vrot.lane.b32.xlu0 %v1549_v63, %s2532_s18  ;;  %v1658_v1 = vrot.slane %v1549_v63, 4  ;;  %v1890_v46 = vsel %vm1885_vm6, %v2906_v17, %v1878_v38 }
0x12b1   :  { %1659 = vrot.lane.b32.xlu0 %v1658_v1, %s2532_s18 }
0x131f   :  { %v1557_v2 = vpop.permute.xlu1 %1556  ;;  %v1552_v3 = vpop.permute.xlu0 %1551 }
0x1320   :  { %v1559_v8 = vsel %vm179_vm4, %v1552_v3, %v1557_v2  ;;  %v81_v2 = vld [vmem:[%s3024_s6 + $0x10] sm:$0xf]  ;;  %v80_v3 = vld [vmem:[%s3024_s6 + $0x8] sm:$0xff] }
0x1321   :  { %v1561_v10 = vrot.slane %v1559_v8, 4  ;;  %2313 = vmatprep.subr.msk.mxu1 %vm183_vm3, %v81_v2 }
0x1323   :  { %v1660_v12 = vpop.permute.xlu0 %1659  ;;  %2289 = vmatmul.mubr.msk.f32.vlgmr.msra.gmra.mxu1 %vm287_vm5, %v1561_v10 }
0x1324   :  { %2298 = vmatmul.mubr.msk.f32.vlgmr.msra.gmra.mxu0 %vm179_vm4, %v1660_v12  ;;  %2314 = vmatpush3.msk.msra.mxu1 %vm183_vm3, %v81_v2 }
0x1325   :  { %2301 = vmatpush3.msra.mxu0 %v2644_v25  ;;  %2310 = vmatprep.mubr.msk.f32.mxu0 %vm2528_vm0, %v2527_v0 }
0x1326   :  { %2302 = vmatprep.subr.mxu0 %v2527_v0  ;;  %2315 = vmatprep.subr.mxu1 %v80_v3 }
0x1327   :  { %2303 = vmatpush3.msra.mxu0 %v2649_v26  ;;  %2316 = vmatpush3.msra.mxu1 %v80_v3 }
0x1328   :  { %2304 = vmatprep.subr.mxu0 %v2527_v0 }
0x1329   :  { %2305 = vmatpush3.msra.mxu0 %v2656_v27 }
0x132a   :  { %2306 = vmatprep.subr.mxu0 %v2527_v0 }
0x132b   :  { %2307 = vmatpush3.msra.mxu0 %v2663_v28 }
0x132c   :  { %2308 = vmatprep.subr.mxu0 %v2527_v0 }
0x132d   :  { %2309 = vmatpush3.msra.mxu0 %v2673_v30 }
0x13e3   :  { %v1630_v25 = vpop.f32.mrf.mxu1 }
0x13e4   :  { %v1631_v13 = vadd.f32 %v2702_v35, %v1630_v25  ;;  %v1729_v14 = vpop.f32.mrf.mxu0 }
0x13e5   :  { %v1734_v15 = vrot.slane %v1729_v14, 2  ;;  %v2290_v16 = vpop.f32.mrf.mxu1 }
0x13e6   :  { %2435 = vtanh.f32 %v1631_v13  ;;  %v2299_v26 = vpop.f32.mrf.mxu0  ;;  %v2034_v0 = vmul.f32 -1.442695, %v1631_v13 }
0x13e7   :  { %v1736_v18 = vadd.f32 %v1734_v15, %v2631_v9  ;;  %v2040_v15 = vld [vmem:[%s3025_s7] ss:$0 sm:$0xff] }
0x13e9   :  { %2437 = vtanh.f32 %v1736_v18  ;;  %v2037_v28 = vmul.f32 -1.442695, %v1736_v18 }
0x13ea   :  { %2439 = vpow2.f32 %v2034_v0 }
0x13eb   :  { %2441 = vpow2.f32 %v2037_v28 }
0x13f3   :  { %v2436_v27 = vpop.eup %2435 }
0x13f4   :  { %1643 = vrot.lane.b32.xlu1 %v2436_v27, %s2529_s2 }
0x13f6   :  { %v2438_v19 = vpop.eup %2437 }
0x13f7   :  { %1749 = vrot.lane.b32.xlu0 %v2438_v19, %s2529_s2  ;;  %v2440_v30 = vpop.eup %2439 }
0x13f8   :  { %v2442_v35 = vpop.eup %2441  ;;  %v1637_v20 = vadd.f32 1.0, %v2440_v30 }
0x13f9   :  { %v1740_v21 = vadd.f32 1.0, %v2442_v35 }
0x13fa   :  { %2443 = vrcp.f32 %v1637_v20 }
0x13fb   :  { %2445 = vrcp.f32 %v1740_v21 }
0x1407   :  { %v2444_v22 = vpop.eup %2443 }
0x1408   :  { %v2446_v24 = vpop.eup %2445  ;;  %v1641_v4 = vmul.f32 %v2444_v22, %v2943_v54 }
0x1409   :  { %v1747_v33 = vmul.f32 %v2446_v24, %v1745_v5 }
0x1466   :  { %v1644_v23 = vpop.permute.xlu1 %1643 }
0x1467   :  { %v1646_v9 = vmul.f32 %v2444_v22, %v1644_v23 }
0x1469   :  { %v1750_v29 = vpop.permute.xlu0 %1749  ;;  %1648 = vrot.lane.b32.xlu1 %v1646_v9, %s2530_s28 }
0x146a   :  { %v1752_v11 = vmul.f32 %v2446_v24, %v1750_v29 }
0x146c   :  { %1754 = vrot.lane.b32.xlu0 %v1752_v11, %s2530_s28 }
0x14db   :  { %v1649_v31 = vpop.permute.xlu1 %1648 }
0x14dc   :  { %v1651_v32 = vadd.f32 %v1649_v31, %v1641_v4 }
0x14de   :  { %2447 = vtanh.f32 %v1651_v32  ;;  %v1755_v34 = vpop.permute.xlu0 %1754 }
0x14df   :  { %v1757_v6 = vadd.f32 %v1755_v34, %v1747_v33 }
0x14e1   :  { %2449 = vtanh.f32 %v1757_v6 }
0x14eb   :  { %v2448_v36 = vpop.eup %2447 }
0x14ec   :  { %1654 = vrot.lane.b32.xlu1 %v2448_v36, %s2531_s15 }
0x14ee   :  { %v2450_v37 = vpop.eup %2449 }
0x14ef   :  { %1760 = vrot.lane.b32.xlu0 %v2450_v37, %s2531_s15 }
0x155e   :  { %v1655_v39 = vpop.permute.xlu1 %1654 }
0x155f   :  { %v1657_v41 = vmul.f32 %v2444_v22, %v1655_v39 }
0x1561   :  { %v1769_v42 = vrot.slane %v1657_v41, 2  ;;  %v1880_v43 = vrot.slane %v1657_v41, 4  ;;  %v1761_v44 = vpop.permute.xlu0 %1760 }
0x1562   :  { %v1763_v45 = vmul.f32 %v2446_v24, %v1761_v44 }
0x1563   :  { %1770 = vrot.lane.b32.xlu0 %v1769_v42, %s2529_s2  ;;  %v1891_v47 = vsel %vm183_vm3, %v1890_v46, %v1880_v43 }
0x1564   :  { %1765 = vrot.lane.b32.xlu1 %v1763_v45, %s2532_s18 }
0x15d5   :  { %v1771_v48 = vpop.permute.xlu0 %1770 }
0x15d6   :  { %v1766_v49 = vpop.permute.xlu1 %1765 }
0x15d7   :  { %v1773_v50 = vsel %vm179_vm4, %v1766_v49, %v1771_v48 }
0x15d8   :  { %v1775_v51 = vrot.slane %v1773_v50, 6 }
0x15da   :  { %2311 = vmatmul.mubr.msk.f32.vlgmr.msra.gmra.mxu0 %vm287_vm5, %v1775_v51 }
0x169a   :  { %v1844_v52 = vpop.f32.mrf.mxu0 }
0x169b   :  { %v1845_v54 = vadd.f32 %v2459_v53, %v1844_v52 }
0x169c   :  { %v2312_v55 = vpop.f32.mrf.mxu0 }
0x169d   :  { %2451 = vtanh.f32 %v1845_v54  ;;  %v2039_v17 = vmul.f32 -1.442695, %v1845_v54 }
0x169f   :  { %2453 = vpow2.f32 %v2039_v17 }
0x16aa   :  { %v2452_v56 = vpop.eup %2451 }
0x16ab   :  { %1857 = vrot.lane.b32.xlu1 %v2452_v56, %s2529_s2 }
0x16ac   :  { %v2454_v57 = vpop.eup %2453 }
0x16ad   :  { %v1851_v58 = vadd.f32 1.0, %v2454_v57 }
0x16af   :  { %2455 = vrcp.f32 %v1851_v58 }
0x16bc   :  { %v2456_v7 = vpop.eup %2455 }
0x16bd   :  { %v1855_v61 = vmul.f32 %v2456_v7, %v1651_v32 }
0x171d   :  { %v1858_v59 = vpop.permute.xlu1 %1857 }
0x171e   :  { %v1860_v60 = vmul.f32 %v2456_v7, %v1858_v59 }
0x1720   :  { %1862 = vrot.lane.b32.xlu0 %v1860_v60, %s2530_s28 }
0x1724   :  { %1901 = vrot.lane.b32.xlu0 %v2864_v40, %s2532_s18  ;;  %v79_v40 = vld [vmem:[%s3024_s6] sm:$0xff] }
0x1725   :  { %2317 = vmatprep.subr.mxu1 %v79_v40 }
0x1726   :  { %2318 = vmatpush3.msra.mxu1 %v79_v40 }
0x1792   :  { %v1863_v62 = vpop.permute.xlu0 %1862 }
0x1793   :  { %v1865_v63 = vadd.f32 %v1863_v62, %v1855_v61 }
0x1795   :  { %2457 = vtanh.f32 %v1865_v63 }
0x1796   :  { %v1902_v1 = vpop.permute.xlu0 %1901 }
0x1797   :  { %2319 = vmatprep.mubr.msk.f32.mxu1 %vm179_vm4, %v1902_v1 }
0x17a2   :  { %v2458_v8 = vpop.eup %2457 }
0x17a3   :  { %1868 = vrot.lane.b32.xlu1 %v2458_v8, %s2531_s15 }
0x1815   :  { %v1869_v10 = vpop.permute.xlu1 %1868 }
0x1816   :  { %v1871_v12 = vmul.f32 %v2456_v7, %v1869_v10 }
0x1818   :  { %v1883_v25 = vrot.slane %v1871_v12, 2 }
0x181a   :  { %v1892_v13 = vsel %vm1888_vm7, %v1891_v47, %v1883_v25 }
0x181b   :  { %1903 = vrot.lane.b32.xlu1 %v1892_v13, %s2532_s18 }
0x188d   :  { %v1904_v14 = vpop.permute.xlu1 %1903 }
0x188e   :  { %2320 = vmatmul.mubr.msk.f32.vlgmr.msra.gmra.mxu1 %vm179_vm4, %v1904_v14 }
0x194e   :  { %v2321_v16 = vpop.f32.mrf.mxu1 }
0x194f   :  { %v1984_v26 = vadd.f32 %v2321_v16, %v2040_v15 }
0x1950   :  { %v1978_v18 = vpop.f32.mrf.mxu1 }
0x1951   :  { %1989 = vst.msk [vmem:[%s3026_s8 + $0x8] sm:$0xff] %vm1987_vm8, %v1984_v26  ;;  %v1979_v27 = vadd.f32 %v2040_v15, %v1978_v18 }
0x1953   :  { %1988 = vst.msk [vmem:[%s3026_s8] sm:$0xff] %vm1987_vm8, %v1979_v27 }
0x1954   :  { %1994 = vsyncpa [#allocation3], 1 }
0x1955   :  { %1995 = vsyncpa [#allocation5], 1 }

</bundles_post_ra>
